<compile_context>
chip_gen: v7x
topology: tpu7x:2x2x1
jax: 0.10.0
libtpu: 0.0.40
codegen_flags: <defaults>
</compile_context>

<pallas_src>
import functools

import jax
import jax.numpy as jnp
from jax.experimental import pallas as pl
from jax.experimental.pallas import tpu as pltpu

LN_EPS = 1e-5  # PyTorch nn.LayerNorm default


def _layernorm(h, gamma, beta):
    # PyTorch LayerNorm: biased variance over the last dim, eps inside rsqrt.
    mu = jnp.mean(h, axis=-1, keepdims=True)
    var = jnp.mean((h - mu) * (h - mu), axis=-1, keepdims=True)
    return (h - mu) * jax.lax.rsqrt(var + LN_EPS) * gamma + beta


def _silu(h):
    return h * jax.nn.sigmoid(h)


def _bf16_dot(a_f32, w_bf16):
    # MXU matmul: bf16 x bf16 -> f32 accumulation.
    return jnp.dot(a_f32.astype(jnp.bfloat16), w_bf16,
                   preferred_element_type=jnp.float32)


def _resnet_block_kernel(
    x_ref, temb_ref,
    g1_ref, be1_ref,          # norm1 weight / bias             (1, Cin)       f32
    w1t_ref, b12_ref,         # fused [W1; Wt]^T bf16, folded bias (1, Cout)   f32
    g2_ref, be2_ref,          # norm2 weight / bias             (1, Cout)      f32
    w2_ref, b2_ref,           # fc2 W^T (bf16) / bias (f32)
    *rest,                    # [wa_ref, ba_ref,] out_ref
    has_adjust,
):
    if has_adjust:
        wa_ref, ba_ref, out_ref = rest
    else:
        (out_ref,) = rest

    x = x_ref[...].astype(jnp.float32)
    temb = temb_ref[...].astype(jnp.float32)

    # Fused fc1 + temb_proj: one K=(Cin+Ct) contraction over
    # [silu(norm1(x)) || silu(temb)]  (fc1/temb_proj biases folded into b12).
    h1 = _silu(_layernorm(x, g1_ref[...], be1_ref[...]))
    ht = _silu(temb)
    hcat = jnp.concatenate([h1, ht], axis=-1).astype(jnp.bfloat16)
    h = jnp.dot(hcat, w1t_ref[...], preferred_element_type=jnp.float32) + b12_ref[...]

    # h = fc2(dropout(silu(norm2(h))))   (dropout == identity in eval mode)
    h = _silu(_layernorm(h, g2_ref[...], be2_ref[...]))
    h = _bf16_dot(h, w2_ref[...]) + b2_ref[...]

    # shortcut
    if has_adjust:
        xs = _bf16_dot(x, wa_ref[...]) + ba_ref[...]
    else:
        xs = x  # in_features == out_features -> plain residual, no matmul

    out_ref[...] = (xs + h).astype(out_ref.dtype)


def _round_up(n, m):
    return ((n + m - 1) // m) * m


def _cdiv(a, b):
    return (a + b - 1) // b


def _choose_tile(batch, tb_max, min_steps):
    """Batch tile: multiple of 8, big enough to amortize per-step overhead,
    small enough to give >= min_steps grid steps (v7x 2-TC sharding) and to
    keep zero-padding minimal for ragged batches."""
    b8 = _round_up(batch, 8)
    max_steps = max(1, b8 // 8)
    n_steps = max(min_steps, _cdiv(b8, max(8, tb_max)))
    n_steps = max(1, min(n_steps, max_steps))
    return _round_up(_cdiv(batch, n_steps), 8)


def _vmem_budget_bytes(tb, cin, ct, cout, io_itemsize, has_adjust):
    act_io = 2 * tb * (cin + ct + cout) * io_itemsize            # double-buffered x/temb/out tiles
    w_bf16 = 2 * 2 * ((cin + ct) * cout + cout * cout
                      + (cin * cout if has_adjust else 0))       # bf16 weights (x2 buffers)
    vecs = 2 * 4 * 4 * (cin + 3 * cout)                          # gammas/betas/biases (f32)
    scratch = 6 * tb * max(cin + ct, cout) * 4                   # f32 intermediates headroom
    return act_io + w_bf16 + vecs + scratch + (4 << 20)


# Keep the VMEM request <= 40 MiB: safe on v7x (64 MiB physical) and far above
# what this kernel needs on v5e/v6e (128 MiB).
_VMEM_CAP = 40 * 1024 * 1024


def resnet_block(x, temb, params, *, tb_max=1024, min_steps=2, io_dtype=None):
    """x: [B, Cin], temb: [B, Ct].  Returns [B, Cout] in io_dtype (default x.dtype).

    io_dtype=jnp.bfloat16 halves the streamed activation/output HBM bytes
    (the kernel is HBM-bound); all LayerNorm/SiLU math stays f32 in-kernel.
    """
    B, cin = x.shape
    ct = temb.shape[1]
    cout = params["w2"].shape[1]
    has_adjust = "wa" in params
    if io_dtype is None:
        io_dtype = x.dtype
    io_itemsize = jnp.dtype(io_dtype).itemsize

    x = x.astype(io_dtype)
    temb = temb.astype(io_dtype)

    # Tile selection: multiple of 8, >= min_steps grid steps, within VMEM cap.
    tb = _choose_tile(B, tb_max, min_steps)
    while tb > 8 and _vmem_budget_bytes(tb, cin, ct, cout, io_itemsize, has_adjust) > _VMEM_CAP:
        tb = _round_up(max(8, tb // 2), 8)

    b_pad = _round_up(B, tb)
    if b_pad != B:
        x = jnp.pad(x, ((0, b_pad - B), (0, 0)))
        temb = jnp.pad(temb, ((0, b_pad - B), (0, 0)))

    weight_args = [
        params["g1"], params["be1"],
        params["w1t"], params["b12"],
        params["g2"], params["be2"],
        params["w2"], params["b2"],
    ]
    if has_adjust:
        weight_args += [params["wa"], params["ba"]]

    # Grid-invariant operands: constant block index -> VMEM-resident across all
    # grid steps (no re-DMA).  pipeline_mode=pl.Buffered(1) could drop their
    # second buffer, but they total < 1 MiB here, so keep defaults for safety.
    def resident_spec(a):
        return pl.BlockSpec(a.shape, lambda i: (0, 0))

    grid = (pl.cdiv(b_pad, tb),)
    in_specs = (
        [pl.BlockSpec((tb, cin), lambda i: (i, 0)),
         pl.BlockSpec((tb, ct), lambda i: (i, 0))]
        + [resident_spec(a) for a in weight_args]
    )

    weight_bytes = sum(int(a.size) * a.dtype.itemsize for a in weight_args)
    flops = 2 * b_pad * ((cin + ct) * cout + cout * cout
                         + (cin * cout if has_adjust else 0))
    cost = pl.CostEstimate(
        flops=int(flops),
        transcendentals=int(b_pad * (cin + ct + 2 * cout)),
        bytes_accessed=int(b_pad * (cin + ct + cout) * io_itemsize + weight_bytes),
    )

    vmem_limit = int(max(
        16 << 20,
        min(_VMEM_CAP,
            _vmem_budget_bytes(tb, cin, ct, cout, io_itemsize, has_adjust))))

    out = pl.pallas_call(
        functools.partial(_resnet_block_kernel, has_adjust=has_adjust),
        out_shape=jax.ShapeDtypeStruct((b_pad, cout), io_dtype),
        grid=grid,
        in_specs=in_specs,
        out_specs=pl.BlockSpec((tb, cout), lambda i: (i, 0)),
        compiler_params=pltpu.CompilerParams(
            dimension_semantics=("parallel",),
            vmem_limit_bytes=vmem_limit,
        ),
        cost_estimate=cost,
    )(x, temb, *weight_args)

    return out[:B]


def init_params(key, in_features, out_features, temb_features):
    """Deterministic synthetic params (PyTorch-shaped, pre-transposed, bf16 weights,
    fc1/temb_proj fused into a single (Cin+Ct, Cout) weight with folded bias)."""
    ks = jax.random.split(key, 8)

    def lin(kw, kb, fan_in, fan_out):
        bound = 1.0 / (fan_in ** 0.5)
        w = jax.random.uniform(kw, (fan_in, fan_out), jnp.float32, -bound, bound)
        b = jax.random.uniform(kb, (1, fan_out), jnp.float32, -bound, bound)
        return w, b

    w1, b1 = lin(ks[0], ks[1], in_features, out_features)
    wt, bt = lin(ks[2], ks[3], temb_features, out_features)
    w2, b2 = lin(ks[4], ks[5], out_features, out_features)

    params = dict(
        g1=jnp.ones((1, in_features), jnp.float32),
        be1=jnp.zeros((1, in_features), jnp.float32),
        w1t=jnp.concatenate([w1, wt], axis=0).astype(jnp.bfloat16),  # fused fc1 | temb_proj
        b12=b1 + bt,                                                 # folded biases
        g2=jnp.ones((1, out_features), jnp.float32),
        be2=jnp.zeros((1, out_features), jnp.float32),
        w2=w2.astype(jnp.bfloat16),
        b2=b2,
    )
    if in_features != out_features:
        wa, ba = lin(ks[6], ks[7], in_features, out_features)
        params["wa"] = wa.astype(jnp.bfloat16)
        params["ba"] = ba
    return params


def resnet_block_ref(x, temb, params, io_dtype=jnp.float32):
    """Pure-JAX reference mirroring the kernel math/precision exactly."""
    has_adjust = "wa" in params
    x = x.astype(io_dtype).astype(jnp.float32)
    temb = temb.astype(io_dtype).astype(jnp.float32)
    h1 = _silu(_layernorm(x, params["g1"], params["be1"]))
    ht = _silu(temb)
    hcat = jnp.concatenate([h1, ht], axis=-1)
    h = _bf16_dot(hcat, params["w1t"]) + params["b12"]
    h = _silu(_layernorm(h, params["g2"], params["be2"]))
    h = _bf16_dot(h, params["w2"]) + params["b2"]
    if has_adjust:
        xs = _bf16_dot(x, params["wa"]) + params["ba"]
    else:
        xs = x
    return (xs + h).astype(io_dtype)


if __name__ == "__main__":
    key = jax.random.PRNGKey(0)

    # Case 1: in != out -> adjust_fc path, f32 IO, B a multiple of the tile.
    B1, IN1, OUT1, TEMB1 = 256, 128, 256, 128
    k1, k2, k3, k4, k5, k6 = jax.random.split(key, 6)
    x1 = jax.random.normal(k1, (B1, IN1), jnp.float32)
    t1 = jax.random.normal(k2, (B1, TEMB1), jnp.float32)
    p1 = init_params(k3, IN1, OUT1, TEMB1)

    out1 = jax.jit(functools.partial(resnet_block, params=p1))(x1, t1)
    out1 = jax.block_until_ready(out1)
    ref1 = resnet_block_ref(x1, t1, p1)
    assert out1.shape == (B1, OUT1)
    assert jnp.allclose(out1, ref1, atol=1e-2, rtol=1e-2), "mismatch (adjust path)"

    # Case 2: in == out -> pure residual (no adjust matmul); ragged B exercises
    # minimal padding (200 -> 208, not 256); bf16 IO exercises the reduced-HBM path.
    B2, IN2, TEMB2 = 200, 128, 128
    x2 = jax.random.normal(k4, (B2, IN2), jnp.float32)
    t2 = jax.random.normal(k5, (B2, TEMB2), jnp.float32)
    p2 = init_params(k6, IN2, IN2, TEMB2)

    out2 = jax.jit(functools.partial(resnet_block, params=p2,
                                     io_dtype=jnp.bfloat16))(x2, t2)
    out2 = jax.block_until_ready(out2)
    ref2 = resnet_block_ref(x2, t2, p2, io_dtype=jnp.bfloat16)
    assert out2.shape == (B2, IN2)
    assert out2.dtype == jnp.bfloat16
    assert jnp.allclose(out2.astype(jnp.float32), ref2.astype(jnp.float32),
                        atol=5e-2, rtol=5e-2), "mismatch (identity / bf16 io path)"

    print("KERNEL_OK")
</pallas_src>

<mosaic_0001>
module attributes {stable_mosaic.version = 11 : i64} {
  func.func @_resnet_block_kernel(%arg0: i32, %arg1: memref<128x128xf32, #tpu.memory_space<vmem>>, %arg2: memref<128x128xf32, #tpu.memory_space<vmem>>, %arg3: memref<1x128xf32, #tpu.memory_space<vmem>>, %arg4: memref<1x128xf32, #tpu.memory_space<vmem>>, %arg5: memref<256x256xbf16, #tpu.memory_space<vmem>>, %arg6: memref<1x256xf32, #tpu.memory_space<vmem>>, %arg7: memref<1x256xf32, #tpu.memory_space<vmem>>, %arg8: memref<1x256xf32, #tpu.memory_space<vmem>>, %arg9: memref<256x256xbf16, #tpu.memory_space<vmem>>, %arg10: memref<1x256xf32, #tpu.memory_space<vmem>>, %arg11: memref<128x256xbf16, #tpu.memory_space<vmem>>, %arg12: memref<1x256xf32, #tpu.memory_space<vmem>>, %arg13: memref<128x256xf32, #tpu.memory_space<vmem>>) attributes {dimension_semantics = [#tpu.dimension_semantics<parallel>], iteration_bounds = array<i64: 2>, scalar_prefetch = 0 : i64, scratch_operands = 0 : i64, tpu.core_type = #tpu.core_type<tc>, window_params = [{transform_indices = @transform_0, window_bounds = array<i64: 128, 128>}, {transform_indices = @transform_1, window_bounds = array<i64: 128, 128>}, {pipeline_mode = #tpu.pipeline_mode<synchronous>, transform_indices = @transform_2, window_bounds = array<i64: 1, 128>}, {pipeline_mode = #tpu.pipeline_mode<synchronous>, transform_indices = @transform_3, window_bounds = array<i64: 1, 128>}, {pipeline_mode = #tpu.pipeline_mode<synchronous>, transform_indices = @transform_4, window_bounds = array<i64: 256, 256>}, {pipeline_mode = #tpu.pipeline_mode<synchronous>, transform_indices = @transform_5, window_bounds = array<i64: 1, 256>}, {pipeline_mode = #tpu.pipeline_mode<synchronous>, transform_indices = @transform_6, window_bounds = array<i64: 1, 256>}, {pipeline_mode = #tpu.pipeline_mode<synchronous>, transform_indices = @transform_7, window_bounds = array<i64: 1, 256>}, {pipeline_mode = #tpu.pipeline_mode<synchronous>, transform_indices = @transform_8, window_bounds = array<i64: 256, 256>}, {pipeline_mode = #tpu.pipeline_mode<synchronous>, transform_indices = @transform_9, window_bounds = array<i64: 1, 256>}, {pipeline_mode = #tpu.pipeline_mode<synchronous>, transform_indices = @transform_10, window_bounds = array<i64: 128, 256>}, {pipeline_mode = #tpu.pipeline_mode<synchronous>, transform_indices = @transform_11, window_bounds = array<i64: 1, 256>}, {transform_indices = @transform_12, window_bounds = array<i64: 128, 256>}]} {
    %c0 = arith.constant 0 : index
    %c0_0 = arith.constant 0 : index
    %0 = vector.load %arg1[%c0, %c0_0] : memref<128x128xf32, #tpu.memory_space<vmem>>, vector<128x128xf32>
    %c0_1 = arith.constant 0 : index
    %c0_2 = arith.constant 0 : index
    %1 = vector.load %arg2[%c0_1, %c0_2] : memref<128x128xf32, #tpu.memory_space<vmem>>, vector<128x128xf32>
    %c0_3 = arith.constant 0 : index
    %c0_4 = arith.constant 0 : index
    %2 = vector.load %arg3[%c0_3, %c0_4] : memref<1x128xf32, #tpu.memory_space<vmem>>, vector<1x128xf32>
    %c0_5 = arith.constant 0 : index
    %c0_6 = arith.constant 0 : index
    %3 = vector.load %arg4[%c0_5, %c0_6] : memref<1x128xf32, #tpu.memory_space<vmem>>, vector<1x128xf32>
    %cst = arith.constant dense<0.000000e+00> : vector<128xf32>
    %4 = vector.multi_reduction <add>, %0, %cst [1] : vector<128x128xf32> to vector<128xf32>
    %5 = vector.shape_cast %4 : vector<128xf32> to vector<128x1xf32>
    %cst_7 = arith.constant 1.280000e+02 : f32
    %6 = vector.broadcast %cst_7 : f32 to vector<128x1xf32>
    %7 = arith.divf %5, %6 : vector<128x1xf32>
    %8 = vector.broadcast %7 : vector<128x1xf32> to vector<128x128xf32>
    %9 = arith.subf %0, %8 : vector<128x128xf32>
    %10 = vector.broadcast %7 : vector<128x1xf32> to vector<128x128xf32>
    %11 = arith.subf %0, %10 : vector<128x128xf32>
    %12 = arith.mulf %9, %11 : vector<128x128xf32>
    %cst_8 = arith.constant dense<0.000000e+00> : vector<128xf32>
    %13 = vector.multi_reduction <add>, %12, %cst_8 [1] : vector<128x128xf32> to vector<128xf32>
    %14 = vector.shape_cast %13 : vector<128xf32> to vector<128x1xf32>
    %cst_9 = arith.constant 1.280000e+02 : f32
    %15 = vector.broadcast %cst_9 : f32 to vector<128x1xf32>
    %16 = arith.divf %14, %15 : vector<128x1xf32>
    %17 = vector.broadcast %7 : vector<128x1xf32> to vector<128x128xf32>
    %18 = arith.subf %0, %17 : vector<128x128xf32>
    %cst_10 = arith.constant 9.99999974E-6 : f32
    %19 = vector.broadcast %cst_10 : f32 to vector<128x1xf32>
    %20 = arith.addf %16, %19 : vector<128x1xf32>
    %21 = math.rsqrt %20 : vector<128x1xf32>
    %22 = vector.broadcast %21 : vector<128x1xf32> to vector<128x128xf32>
    %23 = arith.mulf %18, %22 : vector<128x128xf32>
    %24 = vector.broadcast %2 : vector<1x128xf32> to vector<128x128xf32>
    %25 = arith.mulf %23, %24 : vector<128x128xf32>
    %26 = vector.broadcast %3 : vector<1x128xf32> to vector<128x128xf32>
    %27 = arith.addf %25, %26 : vector<128x128xf32>
    %28 = arith.negf %27 : vector<128x128xf32>
    %29 = math.exp %28 : vector<128x128xf32>
    %cst_11 = arith.constant 1.000000e+00 : f32
    %30 = vector.broadcast %cst_11 : f32 to vector<128x128xf32>
    %31 = arith.addf %30, %29 : vector<128x128xf32>
    %32 = arith.divf %30, %31 : vector<128x128xf32>
    %33 = arith.mulf %27, %32 : vector<128x128xf32>
    %34 = arith.negf %1 : vector<128x128xf32>
    %35 = math.exp %34 : vector<128x128xf32>
    %cst_12 = arith.constant 1.000000e+00 : f32
    %36 = vector.broadcast %cst_12 : f32 to vector<128x128xf32>
    %37 = arith.addf %36, %35 : vector<128x128xf32>
    %38 = arith.divf %36, %37 : vector<128x128xf32>
    %39 = arith.mulf %1, %38 : vector<128x128xf32>
    %40 = tpu.concatenate %33, %39 in 1 : vector<128x128xf32>, vector<128x128xf32> -> vector<128x256xf32>
    %41 = arith.truncf %40 : vector<128x256xf32> to vector<128x256xbf16>
    %c0_13 = arith.constant 0 : index
    %c0_14 = arith.constant 0 : index
    %42 = vector.load %arg5[%c0_13, %c0_14] : memref<256x256xbf16, #tpu.memory_space<vmem>>, vector<256x256xbf16>
    %cst_15 = arith.constant dense<0.000000e+00> : vector<128x256xf32>
    %43 = tpu.matmul %41, %42, %cst_15 {dimension_numbers = #tpu.dot_dimension_numbers<[1], [0], [0], [1], [0, 0, 1, 1], [], []>} : vector<128x256xbf16>, vector<256x256xbf16>, vector<128x256xf32> -> vector<128x256xf32>
    %c0_16 = arith.constant 0 : index
    %c0_17 = arith.constant 0 : index
    %44 = vector.load %arg6[%c0_16, %c0_17] : memref<1x256xf32, #tpu.memory_space<vmem>>, vector<1x256xf32>
    %45 = vector.broadcast %44 : vector<1x256xf32> to vector<128x256xf32>
    %46 = arith.addf %43, %45 : vector<128x256xf32>
    %c0_18 = arith.constant 0 : index
    %c0_19 = arith.constant 0 : index
    %47 = vector.load %arg7[%c0_18, %c0_19] : memref<1x256xf32, #tpu.memory_space<vmem>>, vector<1x256xf32>
    %c0_20 = arith.constant 0 : index
    %c0_21 = arith.constant 0 : index
    %48 = vector.load %arg8[%c0_20, %c0_21] : memref<1x256xf32, #tpu.memory_space<vmem>>, vector<1x256xf32>
    %cst_22 = arith.constant dense<0.000000e+00> : vector<128xf32>
    %49 = vector.multi_reduction <add>, %46, %cst_22 [1] : vector<128x256xf32> to vector<128xf32>
    %50 = vector.shape_cast %49 : vector<128xf32> to vector<128x1xf32>
    %cst_23 = arith.constant 2.560000e+02 : f32
    %51 = vector.broadcast %cst_23 : f32 to vector<128x1xf32>
    %52 = arith.divf %50, %51 : vector<128x1xf32>
    %53 = vector.broadcast %52 : vector<128x1xf32> to vector<128x256xf32>
    %54 = arith.subf %46, %53 : vector<128x256xf32>
    %55 = vector.broadcast %52 : vector<128x1xf32> to vector<128x256xf32>
    %56 = arith.subf %46, %55 : vector<128x256xf32>
    %57 = arith.mulf %54, %56 : vector<128x256xf32>
    %cst_24 = arith.constant dense<0.000000e+00> : vector<128xf32>
    %58 = vector.multi_reduction <add>, %57, %cst_24 [1] : vector<128x256xf32> to vector<128xf32>
    %59 = vector.shape_cast %58 : vector<128xf32> to vector<128x1xf32>
    %cst_25 = arith.constant 2.560000e+02 : f32
    %60 = vector.broadcast %cst_25 : f32 to vector<128x1xf32>
    %61 = arith.divf %59, %60 : vector<128x1xf32>
    %62 = vector.broadcast %52 : vector<128x1xf32> to vector<128x256xf32>
    %63 = arith.subf %46, %62 : vector<128x256xf32>
    %cst_26 = arith.constant 9.99999974E-6 : f32
    %64 = vector.broadcast %cst_26 : f32 to vector<128x1xf32>
    %65 = arith.addf %61, %64 : vector<128x1xf32>
    %66 = math.rsqrt %65 : vector<128x1xf32>
    %67 = vector.broadcast %66 : vector<128x1xf32> to vector<128x256xf32>
    %68 = arith.mulf %63, %67 : vector<128x256xf32>
    %69 = vector.broadcast %47 : vector<1x256xf32> to vector<128x256xf32>
    %70 = arith.mulf %68, %69 : vector<128x256xf32>
    %71 = vector.broadcast %48 : vector<1x256xf32> to vector<128x256xf32>
    %72 = arith.addf %70, %71 : vector<128x256xf32>
    %73 = arith.negf %72 : vector<128x256xf32>
    %74 = math.exp %73 : vector<128x256xf32>
    %cst_27 = arith.constant 1.000000e+00 : f32
    %75 = vector.broadcast %cst_27 : f32 to vector<128x256xf32>
    %76 = arith.addf %75, %74 : vector<128x256xf32>
    %77 = arith.divf %75, %76 : vector<128x256xf32>
    %78 = arith.mulf %72, %77 : vector<128x256xf32>
    %c0_28 = arith.constant 0 : index
    %c0_29 = arith.constant 0 : index
    %79 = vector.load %arg9[%c0_28, %c0_29] : memref<256x256xbf16, #tpu.memory_space<vmem>>, vector<256x256xbf16>
    %80 = arith.truncf %78 : vector<128x256xf32> to vector<128x256xbf16>
    %cst_30 = arith.constant dense<0.000000e+00> : vector<128x256xf32>
    %81 = tpu.matmul %80, %79, %cst_30 {dimension_numbers = #tpu.dot_dimension_numbers<[1], [0], [0], [1], [0, 0, 1, 1], [], []>} : vector<128x256xbf16>, vector<256x256xbf16>, vector<128x256xf32> -> vector<128x256xf32>
    %c0_31 = arith.constant 0 : index
    %c0_32 = arith.constant 0 : index
    %82 = vector.load %arg10[%c0_31, %c0_32] : memref<1x256xf32, #tpu.memory_space<vmem>>, vector<1x256xf32>
    %83 = vector.broadcast %82 : vector<1x256xf32> to vector<128x256xf32>
    %84 = arith.addf %81, %83 : vector<128x256xf32>
    %c0_33 = arith.constant 0 : index
    %c0_34 = arith.constant 0 : index
    %85 = vector.load %arg11[%c0_33, %c0_34] : memref<128x256xbf16, #tpu.memory_space<vmem>>, vector<128x256xbf16>
    %86 = arith.truncf %0 : vector<128x128xf32> to vector<128x128xbf16>
    %cst_35 = arith.constant dense<0.000000e+00> : vector<128x256xf32>
    %87 = tpu.matmul %86, %85, %cst_35 {dimension_numbers = #tpu.dot_dimension_numbers<[1], [0], [0], [1], [0, 0, 1, 1], [], []>} : vector<128x128xbf16>, vector<128x256xbf16>, vector<128x256xf32> -> vector<128x256xf32>
    %c0_36 = arith.constant 0 : index
    %c0_37 = arith.constant 0 : index
    %88 = vector.load %arg12[%c0_36, %c0_37] : memref<1x256xf32, #tpu.memory_space<vmem>>, vector<1x256xf32>
    %89 = vector.broadcast %88 : vector<1x256xf32> to vector<128x256xf32>
    %90 = arith.addf %87, %89 : vector<128x256xf32>
    %91 = arith.addf %90, %84 : vector<128x256xf32>
    %c0_38 = arith.constant 0 : index
    %c0_39 = arith.constant 0 : index
    %92 = vector.load %arg13[%c0_38, %c0_39] : memref<128x256xf32, #tpu.memory_space<vmem>>, vector<128x256xf32>
    tpu.vector_store %arg13[%c0_38, %c0_39], %91 {strides = array<i32>} : memref<128x256xf32, #tpu.memory_space<vmem>>, vector<128x256xf32>,
    return
  }
  func.func @transform_0(%arg0: i32) -> (i32, i32) {
    %c0_i32 = arith.constant 0 : i32
    %c0_i32_0 = arith.constant 0 : i32
    return %arg0, %c0_i32 : i32, i32
  }
  func.func @transform_1(%arg0: i32) -> (i32, i32) {
    %c0_i32 = arith.constant 0 : i32
    %c0_i32_0 = arith.constant 0 : i32
    return %arg0, %c0_i32 : i32, i32
  }
  func.func @transform_2(%arg0: i32) -> (i32, i32) {
    %c0_i32 = arith.constant 0 : i32
    %c0_i32_0 = arith.constant 0 : i32
    %c0_i32_1 = arith.constant 0 : i32
    return %c0_i32, %c0_i32_0 : i32, i32
  }
  func.func @transform_3(%arg0: i32) -> (i32, i32) {
    %c0_i32 = arith.constant 0 : i32
    %c0_i32_0 = arith.constant 0 : i32
    %c0_i32_1 = arith.constant 0 : i32
    return %c0_i32, %c0_i32_0 : i32, i32
  }
  func.func @transform_4(%arg0: i32) -> (i32, i32) {
    %c0_i32 = arith.constant 0 : i32
    %c0_i32_0 = arith.constant 0 : i32
    %c0_i32_1 = arith.constant 0 : i32
    return %c0_i32, %c0_i32_0 : i32, i32
  }
  func.func @transform_5(%arg0: i32) -> (i32, i32) {
    %c0_i32 = arith.constant 0 : i32
    %c0_i32_0 = arith.constant 0 : i32
    %c0_i32_1 = arith.constant 0 : i32
    return %c0_i32, %c0_i32_0 : i32, i32
  }
  func.func @transform_6(%arg0: i32) -> (i32, i32) {
    %c0_i32 = arith.constant 0 : i32
    %c0_i32_0 = arith.constant 0 : i32
    %c0_i32_1 = arith.constant 0 : i32
    return %c0_i32, %c0_i32_0 : i32, i32
  }
  func.func @transform_7(%arg0: i32) -> (i32, i32) {
    %c0_i32 = arith.constant 0 : i32
    %c0_i32_0 = arith.constant 0 : i32
    %c0_i32_1 = arith.constant 0 : i32
    return %c0_i32, %c0_i32_0 : i32, i32
  }
  func.func @transform_8(%arg0: i32) -> (i32, i32) {
    %c0_i32 = arith.constant 0 : i32
    %c0_i32_0 = arith.constant 0 : i32
    %c0_i32_1 = arith.constant 0 : i32
    return %c0_i32, %c0_i32_0 : i32, i32
  }
  func.func @transform_9(%arg0: i32) -> (i32, i32) {
    %c0_i32 = arith.constant 0 : i32
    %c0_i32_0 = arith.constant 0 : i32
    %c0_i32_1 = arith.constant 0 : i32
    return %c0_i32, %c0_i32_0 : i32, i32
  }
  func.func @transform_10(%arg0: i32) -> (i32, i32) {
    %c0_i32 = arith.constant 0 : i32
    %c0_i32_0 = arith.constant 0 : i32
    %c0_i32_1 = arith.constant 0 : i32
    return %c0_i32, %c0_i32_0 : i32, i32
  }
  func.func @transform_11(%arg0: i32) -> (i32, i32) {
    %c0_i32 = arith.constant 0 : i32
    %c0_i32_0 = arith.constant 0 : i32
    %c0_i32_1 = arith.constant 0 : i32
    return %c0_i32, %c0_i32_0 : i32, i32
  }
  func.func @transform_12(%arg0: i32) -> (i32, i32) {
    %c0_i32 = arith.constant 0 : i32
    %c0_i32_0 = arith.constant 0 : i32
    return %arg0, %c0_i32 : i32, i32
  }
}

</mosaic_0001>

<bundles_post_ra>
// kernel: resnet_block.1
= control target key start
LH: loop header
LB: loop body
LE: loop exit
PB: predicated region body
PF: predicated region fallthrough
CT: control target
= control target key end

     0   :  { %s4848_s0 = inlined_call_operand.vmem [shape: f32[256,128], index: 0, kind: input, shape index: {}]   ;;  %s4849_s1 = inlined_call_operand.vmem [shape: f32[256,128], index: 1, kind: input, shape index: {}]   ;;  %s4850_s2 = inlined_call_operand.vmem [shape: f32[1,128], index: 2, kind: input, shape index: {}]   ;;  %s4851_s3 = inlined_call_operand.vmem [shape: f32[1,128], index: 3, kind: input, shape index: {}]   ;;  %s4852_s4 = inlined_call_operand.vmem [shape: bf16[256,256], index: 4, kind: input, shape index: {}]   ;;  %s4853_s5 = inlined_call_operand.vmem [shape: f32[1,256], index: 5, kind: input, shape index: {}]   ;;  %s4854_s6 = inlined_call_operand.vmem [shape: f32[1,256], index: 6, kind: input, shape index: {}]   ;;  %s4855_s7 = inlined_call_operand.vmem [shape: f32[1,256], index: 7, kind: input, shape index: {}]   ;;  %s4856_s8 = inlined_call_operand.vmem [shape: bf16[256,256], index: 8, kind: input, shape index: {}]   ;;  %s4857_s9 = inlined_call_operand.vmem [shape: f32[1,256], index: 9, kind: input, shape index: {}]   ;;  %s4858_s10 = inlined_call_operand.vmem [shape: bf16[128,256], index: 10, kind: input, shape index: {}]   ;;  %s4859_s11 = inlined_call_operand.vmem [shape: f32[1,256], index: 11, kind: input, shape index: {}]   ;;  %s4860_s12 = inlined_call_operand.hbm [shape: f32[256,256], index: 12, kind: output, shape index: {}]  }
   0x1   :  { %4865 = sst [smem:[#allocation8_spill]] %s4848_s0 }
   0x2   :  { %17 = vsyncpa [#allocation3], 0 }
   0x3   :  { %19 = vsyncpa [#allocation3 + $0x1], 0  ;;  %s3456_s21 = smov 0   ;;  %s3458_s22 = smov 0  }
   0x4   :  { %s3460_s23 = smov 0   ;;  %s3462_s24 = smov 0  }
   0x5 LB: > { %4866 = sst [smem:[#allocation5_spill]] %s3381_s23  ;;  %s3477_s25 = sadd.s32 4294967295, %s3385_s24   ;;  %s3385_s24 = sphi %s3462_s24, %s4873_s24   ;;  %s3381_s23 = sphi %s3460_s23, %s4875_s23   ;;  %s3377_s22 = sphi %s3458_s22, %s4877_s22   ;;  %s3373_s21 = sphi %s3456_s21, %s4876_s21  }
   0x6   : > { %s2534_s26 = sadd.s32 4294967294, %s3385_s24   ;;  %s3481_s27 = sadd.s32 1, %s3385_s24  }
   0x7   : > { %4867 = sst [smem:[#allocation6_spill]] %s3481_s27  ;;  %s294_s28 = sadd.s32 1, %s3381_s23 }
   0x8   : > { %s291_s29 = ssub.s32 %s3385_s24, %s3481_s27  ;;  %p304_p0 = scmp.ne.s32.totalorder %s3381_s23, %s3377_s22 }
   0x9   : > { %p292_p1 = scmp.eq.s32.totalorder %s291_s29, 0  ;;  %p305_p2 = scmp.eq.s32.totalorder %s3477_s25, 1 }
   0xa   : > { %p310_p3 = scmp.ne.s32.totalorder %s3377_s22, %s3373_s21  ;;  %p311_p4 = scmp.eq.s32.totalorder %s2534_s26, 1 }
   0xb   : > { %s3492_s30 = scalar_select %p292_p1, %s3381_s23, %s294_s28  }
   0xc   : > { %p3494_p5 = por %p305_p2, %p304_p0  ;;  %p3498_p6 = por %p311_p4, %p310_p3 }
   0xd   : > { %4868 = sst [smem:[#allocation7_spill]] %s3492_s30  ;;  %p2537_p7 = scmp.ge.s32.totalorder %s3385_s24, 1 }
   0xe   : > { %p377_p8 = scmp.lt.s32.totalorder %s3385_s24, 3 }
  0x10   : > { %p378_p9 = pnand %p2537_p7, %p377_p8 }
  0x11   : > { %s2539_s15 = sshll.u32 (!%p378_p9), %s3477_s25, 4  ;;  %s4871_s0 = sld [smem:[#allocation8_spill]] (!%p378_p9)  ;;  %v2867_v16 = vld [vmem:[%s4852_s4 + $0x4] ss:$8 sps:$4 sm:$0xff] (!%p378_p9)   ;;  %v2869_v17 = vld [vmem:[%s4852_s4] ss:$8 sps:$4 sm:$0xff] (!%p378_p9)  }
  0x12   : > { %381 = sbr.rel (%p378_p9) target bundleno = 1360 (0x550), region = 68  ;;  %p425_p10 = scmp.lt.s32.totalorder (!%p378_p9), %s2539_s15, 31  ;;  %v2870_v18 = vld [vmem:[%s4852_s4 + $0x14] ss:$8 sps:$4 sm:$0xff] (!%p378_p9)   ;;  %1137 = vmatprep.subr.bf16.mxu0 (!%p378_p9), %v2867_v16  ;;  %v2872_v19 = vld [vmem:[%s4852_s4 + $0x10] ss:$8 sps:$4 sm:$0xff] (!%p378_p9)  }
  0x13   : > { %1138 = vmatpush1.bf16.msra.mxu0 (!%p378_p9), %v2869_v17  ;;  %v2873_v20 = vld [vmem:[%s4852_s4 + $0x24] ss:$8 sps:$4 sm:$0xff] (!%p378_p9)   ;;  %v2875_v59 = vld [vmem:[%s4852_s4 + $0x20] ss:$8 sps:$4 sm:$0xff] (!%p378_p9)   ;;  %s421_s20 = sand.u32 (!%p378_p9), 1, %s3377_s22  }
  0x14   : > { %1139 = vmatprep.subr.bf16.mxu0 (!%p378_p9), %v2870_v18  ;;  %v2879_v18 = vld [vmem:[%s4852_s4 + $0x44] ss:$8 sps:$4 sm:$0xff] (!%p378_p9)   ;;  %s2538_s26 = sshll.u32 (!%p378_p9), %s421_s20, 8 }
  0x17   : > { %1140 = vmatpush1.bf16.msra.mxu0 (!%p378_p9), %v2872_v19 }
  0x18   : > { %1141 = vmatprep.subr.bf16.mxu0 (!%p378_p9), %v2873_v20 }
  0x19   : > { %s4879_s15 = smov (!%p425_p10, %s2539_s15), 31 }
  0x1a   : > { %s4861_s16 = sshll.u32 %s4879_s15, 3  ;;  %s4872_s28 = sshll.u32 %s4879_s15, 3 }
  0x1b   : > { %s3513_s19 = scalar_lea.vmem %s4871_s0, %s4861_s16  ;;  %1142 = vmatpush1.bf16.msra.mxu0 %v2875_v59  ;;  %s3690_s17 = scalar_lea.vmem %s4849_s1, %s4872_s28 }
  0x1c   : > { %v438_v0 = vld [vmem:[%s3513_s19] sm:$0xff]  ;;  %v440_v1 = vld [vmem:[%s3513_s19 + $0x10] sm:$0xff]  ;;  %v439_v2 = vld [vmem:[%s3513_s19 + $0x8] sm:$0xff]  ;;  %s4722_s28 = scalar_lea.vmem [#allocation2], %s2538_s26 }
  0x1d   : > { %472 = vadd.xlane.f32.xlu0 %v438_v0  ;;  %476 = vadd.xlane.f32.xlu1 %v440_v1  ;;  %v441_v3 = vld [vmem:[%s3513_s19 + $0x18] sm:$0xff]  ;;  %v442_v4 = vld [vmem:[%s3513_s19 + $0x20] sm:$0xff]  ;;  %v443_v5 = vld [vmem:[%s3513_s19 + $0x28] sm:$0xff]  ;;  %s2460_s29 = sshll.u32 %s4722_s28, 4  ;;  %s4799_s29 = int_to_ptr.vmem [resolvable:$true] %s2460_s29 }
  0x1e   : > { %v444_v6 = vld [vmem:[%s3513_s19 + $0x30] sm:$0xff]  ;;  %v3523_v7 = vld [vmem:[%s3513_s19 + $0x38] sm:$0xff]  ;;  %v3526_v8 = vld [vmem:[%s3513_s19 + $0x40] sm:$0xff]  ;;  %s3323_s30 = scalar_lea.vmem %s4799_s29, 4096 }
  0x1f   : > { %v3529_v9 = vld [vmem:[%s3513_s19 + $0x48] sm:$0xff]  ;;  %v3533_v10 = vld [vmem:[%s3513_s19 + $0x50] sm:$0xff]  ;;  %v3536_v11 = vld [vmem:[%s3513_s19 + $0x58] sm:$0xff]  ;;  %p3324_p11 = scmp.ne.s32.totalorder %s4799_s29, %s3323_s30 }
  0x20   : > { %v3541_v12 = vld [vmem:[%s3513_s19 + $0x60] sm:$0xff]  ;;  %v3544_v13 = vld [vmem:[%s3513_s19 + $0x68] sm:$0xff]  ;;  %v3551_v14 = vld [vmem:[%s3513_s19 + $0x70] sm:$0xff] }
  0x21   : > { %474 = vadd.xlane.f32.xlu0 %v439_v2  ;;  %478 = vadd.xlane.f32.xlu1 %v441_v3  ;;  %v3554_v15 = vld [vmem:[%s3513_s19 + $0x78] sm:$0xff]  ;;  %p3325_p12 = pnand %p3324_p11, %p3494_p5 }
  0x23   : > { %p3326_p13 = pneg %p3325_p12 }
  0x25   : > { %480 = vadd.xlane.f32.xlu0 %v442_v4  ;;  %482 = vadd.xlane.f32.xlu1 %v443_v5 }
  0x29   : > { %484 = vadd.xlane.f32.xlu0 %v444_v6  ;;  %486 = vadd.xlane.f32.xlu1 %v3523_v7 }
  0x2d   : > { %488 = vadd.xlane.f32.xlu0 %v3526_v8  ;;  %490 = vadd.xlane.f32.xlu1 %v3529_v9 }
  0x31   : > { %492 = vadd.xlane.f32.xlu0 %v3533_v10  ;;  %494 = vadd.xlane.f32.xlu1 %v3536_v11 }
  0x35   : > { %496 = vadd.xlane.f32.xlu0 %v3541_v12  ;;  %498 = vadd.xlane.f32.xlu1 %v3544_v13 }
  0x39   : > { %500 = vadd.xlane.f32.xlu0 %v3551_v14  ;;  %502 = vadd.xlane.f32.xlu1 %v3554_v15 }
  0xaa   : > { %v473_v21 = vpop.xlane.xlu0 %472  ;;  %v477_v22 = vpop.xlane.xlu1 %476 }
  0xab   : > { %v505_v23 = vmul.f32 0.0078125, %v473_v21  ;;  %v507_v24 = vmul.f32 0.0078125, %v477_v22  ;;  %v2881_v21 = vld [vmem:[%s4852_s4 + $0x40] ss:$8 sps:$4 sm:$0xff]  }
  0xad   : > { %v3573_v25 = vsub.f32 %v438_v0, %v505_v23  ;;  %v3575_v26 = vsub.f32 %v440_v1, %v507_v24  ;;  %v2876_v1 = vld [vmem:[%s4852_s4 + $0x34] ss:$8 sps:$4 sm:$0xff]  }
  0xae   : > { %v475_v27 = vpop.xlane.xlu0 %474  ;;  %v479_v28 = vpop.xlane.xlu1 %478  ;;  %1143 = vmatprep.subr.bf16.mxu0 %v2876_v1  ;;  %v2914_v1 = vld [vmem:[%s4852_s4 + $0xf0] ss:$8 sps:$4 sm:$0xff]  }
  0xaf   : > { %v506_v29 = vmul.f32 0.0078125, %v475_v27  ;;  %v537_v30 = vmul.f32 %v3573_v25, %v3573_v25  ;;  %v508_v31 = vmul.f32 0.0078125, %v479_v28  ;;  %v539_v34 = vmul.f32 %v3575_v26, %v3575_v26  ;;  %v2882_v28 = vld [vmem:[%s4852_s4 + $0x54] ss:$8 sps:$4 sm:$0xff]  }
  0xb1   : > { %v3579_v32 = vsub.f32 %v439_v2, %v506_v29  ;;  %553 = vadd.xlane.f32.xlu0 %v537_v30  ;;  %v3581_v33 = vsub.f32 %v441_v3, %v508_v31  ;;  %v2884_v29 = vld [vmem:[%s4852_s4 + $0x50] ss:$8 sps:$4 sm:$0xff]   ;;  %v2885_v30 = vld [vmem:[%s4852_s4 + $0x64] ss:$8 sps:$4 sm:$0xff]   ;;  %v2887_v31 = vld [vmem:[%s4852_s4 + $0x60] ss:$8 sps:$4 sm:$0xff]  }
  0xb2   : > { %v481_v35 = vpop.xlane.xlu0 %480  ;;  %v483_v36 = vpop.xlane.xlu1 %482 }
  0xb3   : > { %v509_v37 = vmul.f32 0.0078125, %v481_v35  ;;  %v538_v38 = vmul.f32 %v3579_v32, %v3579_v32  ;;  %v510_v39 = vmul.f32 0.0078125, %v483_v36  ;;  %v540_v42 = vmul.f32 %v3581_v33, %v3581_v33  ;;  %v2890_v35 = vld [vmem:[%s4852_s4 + $0x70] ss:$8 sps:$4 sm:$0xff]   ;;  %v2891_v36 = vld [vmem:[%s4852_s4 + $0x84] ss:$8 sps:$4 sm:$0xff]  }
  0xb5   : > { %v3587_v40 = vsub.f32 %v442_v4, %v509_v37  ;;  %557 = vadd.xlane.f32.xlu0 %v539_v34  ;;  %555 = vadd.xlane.f32.xlu1 %v538_v38  ;;  %v3589_v41 = vsub.f32 %v443_v5, %v510_v39  ;;  %v2888_v34 = vld [vmem:[%s4852_s4 + $0x74] ss:$8 sps:$4 sm:$0xff]   ;;  %v2893_v37 = vld [vmem:[%s4852_s4 + $0x80] ss:$8 sps:$4 sm:$0xff]  }
  0xb6   : > { %v485_v43 = vpop.xlane.xlu0 %484  ;;  %v487_v44 = vpop.xlane.xlu1 %486  ;;  %v454_v38 = vld [vmem:[%s3690_s17] sm:$0xff]  ;;  %v455_v39 = vld [vmem:[%s3690_s17 + $0x8] sm:$0xff] }
  0xb7   : > { %v511_v45 = vmul.f32 0.0078125, %v485_v43  ;;  %v541_v46 = vmul.f32 %v3587_v40, %v3587_v40  ;;  %v512_v47 = vmul.f32 0.0078125, %v487_v44  ;;  %v542_v50 = vmul.f32 %v3589_v41, %v3589_v41  ;;  %v2894_v44 = vld [vmem:[%s4852_s4 + $0x94] ss:$8 sps:$4 sm:$0xff]  }
  0xb8   : > { %v2562_v43 = vmul.f32 -1.442695, %v455_v39 }
  0xb9   : > { %v3595_v48 = vsub.f32 %v444_v6, %v511_v45  ;;  %559 = vadd.xlane.f32.xlu1 %v540_v42  ;;  %561 = vadd.xlane.f32.xlu0 %v541_v46  ;;  %v3598_v49 = vsub.f32 %v3523_v7, %v512_v47  ;;  %v2878_v7 = vld [vmem:[%s4852_s4 + $0x30] ss:$8 sps:$4 sm:$0xff]   ;;  %v2561_v42 = vmul.f32 -1.442695, %v454_v38  ;;  %v2897_v46 = vld [vmem:[%s4852_s4 + $0xa4] ss:$8 sps:$4 sm:$0xff]  }
  0xba   : > { %v489_v51 = vpop.xlane.xlu0 %488  ;;  %v491_v52 = vpop.xlane.xlu1 %490  ;;  %1144 = vmatpush1.bf16.msra.mxu0 %v2878_v7  ;;  %v2896_v45 = vld [vmem:[%s4852_s4 + $0x90] ss:$8 sps:$4 sm:$0xff]   ;;  %v2899_v47 = vld [vmem:[%s4852_s4 + $0xa0] ss:$8 sps:$4 sm:$0xff]  }
  0xbb   : > { %v513_v53 = vmul.f32 0.0078125, %v489_v51  ;;  %v543_v54 = vmul.f32 %v3595_v48, %v3595_v48  ;;  %v514_v55 = vmul.f32 0.0078125, %v491_v52  ;;  %v544_v58 = vmul.f32 %v3598_v49, %v3598_v49  ;;  %1145 = vmatprep.subr.bf16.mxu0 %v2879_v18  ;;  %v2902_v51 = vld [vmem:[%s4852_s4 + $0xb0] ss:$8 sps:$4 sm:$0xff]   ;;  %v2903_v52 = vld [vmem:[%s4852_s4 + $0xc4] ss:$8 sps:$4 sm:$0xff]  }
  0xbc   : > { %2987 = vpow2.f32 %v2561_v42 }
  0xbd   : > { %v3605_v56 = vsub.f32 %v3526_v8, %v513_v53  ;;  %563 = vadd.xlane.f32.xlu1 %v542_v50  ;;  %565 = vadd.xlane.f32.xlu0 %v543_v54  ;;  %v3608_v57 = vsub.f32 %v3529_v9, %v514_v55  ;;  %2989 = vpow2.f32 %v2562_v43  ;;  %v2900_v50 = vld [vmem:[%s4852_s4 + $0xb4] ss:$8 sps:$4 sm:$0xff]   ;;  %v2905_v54 = vld [vmem:[%s4852_s4 + $0xc0] ss:$8 sps:$4 sm:$0xff]  }
  0xbe   : > { %v493_v60 = vpop.xlane.xlu0 %492  ;;  %v495_v61 = vpop.xlane.xlu1 %494  ;;  %1146 = vmatpush1.bf16.msra.mxu0 %v2881_v21 }
  0xbf   : > { %v515_v62 = vmul.f32 0.0078125, %v493_v60  ;;  %v545_v63 = vmul.f32 %v3605_v56, %v3605_v56  ;;  %v516_v0 = vmul.f32 0.0078125, %v495_v61  ;;  %v546_v4 = vmul.f32 %v3608_v57, %v3608_v57  ;;  %1147 = vmatprep.subr.bf16.mxu0 %v2882_v28  ;;  %v2908_v61 = vld [vmem:[%s4852_s4 + $0xd0] ss:$8 sps:$4 sm:$0xff]  }
  0xc1   : > { %v3621_v2 = vsub.f32 %v3533_v10, %v515_v62  ;;  %567 = vadd.xlane.f32.xlu1 %v544_v58  ;;  %569 = vadd.xlane.f32.xlu0 %v545_v63  ;;  %v3624_v3 = vsub.f32 %v3536_v11, %v516_v0  ;;  %v2906_v58 = vld [vmem:[%s4852_s4 + $0xd4] ss:$8 sps:$4 sm:$0xff]   ;;  %v2909_v62 = vld [vmem:[%s4852_s4 + $0xe4] ss:$8 sps:$4 sm:$0xff]   ;;  %v2911_v63 = vld [vmem:[%s4852_s4 + $0xe0] ss:$8 sps:$4 sm:$0xff]  }
  0xc2   : > { %v497_v5 = vpop.xlane.xlu0 %496  ;;  %v499_v6 = vpop.xlane.xlu1 %498  ;;  %1148 = vmatpush1.bf16.msra.mxu0 %v2884_v29  ;;  %v2912_v0 = vld [vmem:[%s4852_s4 + $0xf4] ss:$8 sps:$4 sm:$0xff]  }
  0xc3   : > { %v517_v8 = vmul.f32 0.0078125, %v497_v5  ;;  %v547_v9 = vmul.f32 %v3621_v2, %v3621_v2  ;;  %v518_v10 = vmul.f32 0.0078125, %v499_v6  ;;  %v548_v17 = vmul.f32 %v3624_v3, %v3624_v3  ;;  %1149 = vmatprep.subr.bf16.mxu0 %v2885_v30 }
  0xc5   : > { %v3634_v16 = vsub.f32 %v3541_v12, %v517_v8  ;;  %571 = vadd.xlane.f32.xlu1 %v546_v4  ;;  %573 = vadd.xlane.f32.xlu0 %v547_v9  ;;  %v3637_v11 = vsub.f32 %v3544_v13, %v518_v10  ;;  %v3737_v9 = vld [vmem:[%s3690_s17 + $0x10] sm:$0xff]  ;;  %v3740_v10 = vld [vmem:[%s3690_s17 + $0x18] sm:$0xff] }
  0xc6   : > { %v501_v19 = vpop.xlane.xlu0 %500  ;;  %v503_v20 = vpop.xlane.xlu1 %502  ;;  %1150 = vmatpush1.bf16.msra.mxu0 %v2887_v31  ;;  %v2564_v18 = vmul.f32 -1.442695, %v3740_v10 }
  0xc7   : > { %v519_v12 = vmul.f32 0.0078125, %v501_v19  ;;  %v549_v22 = vmul.f32 %v3634_v16, %v3634_v16  ;;  %v520_v23 = vmul.f32 0.0078125, %v503_v20  ;;  %v550_v27 = vmul.f32 %v3637_v11, %v3637_v11  ;;  %1151 = vmatprep.subr.bf16.mxu0 %v2888_v34  ;;  %v2988_v53 = vpop.eup %2987  ;;  %v3745_v19 = vld [vmem:[%s3690_s17 + $0x20] sm:$0xff] }
  0xc8   : > { %v2990_v55 = vpop.eup %2989  ;;  %v853_v59 = vadd.f32 1.0, %v2988_v53  ;;  %v2565_v21 = vmul.f32 -1.442695, %v3745_v19  ;;  %v3756_v53 = vld [vmem:[%s3690_s17 + $0x38] sm:$0xff] }
  0xc9   : > { %v3650_v13 = vsub.f32 %v3551_v14, %v519_v12  ;;  %575 = vadd.xlane.f32.xlu1 %v548_v17  ;;  %577 = vadd.xlane.f32.xlu0 %v549_v22  ;;  %v3653_v24 = vsub.f32 %v3554_v15, %v520_v23  ;;  %v854_v60 = vadd.f32 1.0, %v2990_v55  ;;  %v2563_v17 = vmul.f32 -1.442695, %v3737_v9  ;;  %v3749_v22 = vld [vmem:[%s3690_s17 + $0x28] sm:$0xff]  ;;  %v3761_v55 = vld [vmem:[%s4850_s2] ss:$0 sm:$0xff] }
  0xca   : > { %1152 = vmatpush1.bf16.msra.mxu0 %v2890_v35  ;;  %2991 = vrcp.f32 %v853_v59  ;;  %v2566_v29 = vmul.f32 -1.442695, %v3749_v22 }
  0xcb   : > { %v551_v14 = vmul.f32 %v3650_v13, %v3650_v13  ;;  %v552_v15 = vmul.f32 %v3653_v24, %v3653_v24  ;;  %1153 = vmatprep.subr.bf16.mxu0 %v2891_v36  ;;  %2993 = vrcp.f32 %v854_v60 }
  0xcc   : > { %2995 = vpow2.f32 %v2563_v17 }
  0xcd   : > { %579 = vadd.xlane.f32.xlu1 %v550_v27  ;;  %581 = vadd.xlane.f32.xlu0 %v551_v14  ;;  %2997 = vpow2.f32 %v2564_v18 }
  0xce   : > { %1154 = vmatpush1.bf16.msra.mxu0 %v2893_v37  ;;  %2999 = vpow2.f32 %v2565_v21 }
  0xcf   : > { %1155 = vmatprep.subr.bf16.mxu0 %v2894_v44 }
  0xd1   : > { %583 = vadd.xlane.f32.xlu1 %v552_v15 }
  0xd2   : > { %1156 = vmatpush1.bf16.msra.mxu0 %v2896_v45 }
  0xd3   : > { %1157 = vmatprep.subr.bf16.mxu0 %v2897_v46 }
  0xd4   : > { %v2992_v4 = vpop.eup %2991 }
  0xd5   : > { %v2994_v5 = vpop.eup %2993  ;;  %v901_v6 = vmul.f32 %v2992_v4, %v454_v38 }
  0xd6   : > { %1158 = vmatpush1.bf16.msra.mxu0 %v2899_v47  ;;  %v902_v7 = vmul.f32 %v2994_v5, %v455_v39  ;;  %v2996_v34 = vpop.eup %2995 }
  0xd7   : > { %1159 = vmatprep.subr.bf16.mxu0 %v2900_v50  ;;  %v2998_v37 = vpop.eup %2997  ;;  %v855_v44 = vadd.f32 1.0, %v2996_v34  ;;  %v3753_v50 = vld [vmem:[%s3690_s17 + $0x30] sm:$0xff] }
  0xd8   : > { %v918_v8 = vpack.c.bf16 %v902_v7, %v901_v6  ;;  %v856_v47 = vadd.f32 1.0, %v2998_v37  ;;  %v3769_v6 = vld [vmem:[%s4851_s3] ss:$0 sm:$0xff] }
  0xda   : > { %1160 = vmatpush1.bf16.msra.mxu0 %v2902_v51  ;;  %1169 = vmatprep.mubr.bf16.mxu0 %v918_v8 }
  0xdb   : > { %1161 = vmatprep.subr.bf16.mxu0 %v2903_v52 }
  0xde   : > { %1162 = vmatpush1.bf16.msra.mxu0 %v2905_v54  ;;  %v3000_v54 = vpop.eup %2999 }
  0xdf   : > { %1163 = vmatprep.subr.bf16.mxu0 %v2906_v58  ;;  %v857_v17 = vadd.f32 1.0, %v3000_v54 }
  0xe2   : > { %1164 = vmatpush1.bf16.msra.mxu0 %v2908_v61  ;;  %v2567_v61 = vmul.f32 -1.442695, %v3753_v50 }
  0xe3   : > { %1165 = vmatprep.subr.bf16.mxu0 %v2909_v62 }
  0xe6   : > { %1166 = vmatpush1.bf16.msra.mxu0 %v2911_v63 }
  0xe7   : > { %1167 = vmatprep.subr.bf16.mxu0 %v2912_v0 }
  0xea   : > { %1168 = vmatpush1.bf16.msra.mxu0 %v2914_v1  ;;  %v2568_v1 = vmul.f32 -1.442695, %v3756_v53 }
 0x13e   : > { %v554_v20 = vpop.xlane.xlu0 %553 }
 0x13f   : > { %v585_v12 = vmul.f32 0.0078125, %v554_v20 }
 0x141   : > { %v601_v23 = vadd.f32 1e-05, %v585_v12 }
 0x142   : > { %v556_v27 = vpop.xlane.xlu1 %555  ;;  %v558_v28 = vpop.xlane.xlu0 %557 }
 0x143   : > { %3001 = vrsqrt.f32 %v601_v23  ;;  %v586_v14 = vmul.f32 0.0078125, %v556_v27  ;;  %v587_v15 = vmul.f32 0.0078125, %v558_v28  ;;  %v3777_v28 = vld [vmem:[%s3690_s17 + $0x40] sm:$0xff] }
 0x144   : > { %3003 = vpow2.f32 %v2566_v29  ;;  %v2569_v37 = vmul.f32 -1.442695, %v3777_v28 }
 0x145   : > { %v602_v30 = vadd.f32 1e-05, %v586_v14  ;;  %v603_v31 = vadd.f32 1e-05, %v587_v15 }
 0x146   : > { %v560_v35 = vpop.xlane.xlu1 %559  ;;  %v562_v36 = vpop.xlane.xlu0 %561 }
 0x147   : > { %3005 = vrsqrt.f32 %v602_v30  ;;  %v588_v38 = vmul.f32 0.0078125, %v560_v35  ;;  %v589_v39 = vmul.f32 0.0078125, %v562_v36 }
 0x148   : > { %3007 = vrsqrt.f32 %v603_v31 }
 0x149   : > { %v604_v42 = vadd.f32 1e-05, %v588_v38  ;;  %v605_v43 = vadd.f32 1e-05, %v589_v39 }
 0x14a   : > { %v564_v45 = vpop.xlane.xlu1 %563  ;;  %v566_v46 = vpop.xlane.xlu0 %565 }
 0x14b   : > { %3009 = vrsqrt.f32 %v604_v42  ;;  %v590_v51 = vmul.f32 0.0078125, %v564_v45  ;;  %v591_v52 = vmul.f32 0.0078125, %v566_v46 }
 0x14c   : > { %3011 = vrsqrt.f32 %v605_v43 }
 0x14d   : > { %v3002_v58 = vpop.eup %3001  ;;  %v606_v59 = vadd.f32 1e-05, %v590_v51  ;;  %v607_v60 = vadd.f32 1e-05, %v591_v52  ;;  %3013 = vrcp.f32 %v855_v44 }
 0x14e   : > { %v568_v62 = vpop.xlane.xlu1 %567  ;;  %v570_v63 = vpop.xlane.xlu0 %569  ;;  %v633_v0 = vmul.f32 %v3002_v58, %v3573_v25  ;;  %3015 = vrcp.f32 %v856_v47 }
 0x14f   : > { %3017 = vrsqrt.f32 %v606_v59  ;;  %v592_v4 = vmul.f32 0.0078125, %v568_v62  ;;  %v593_v5 = vmul.f32 0.0078125, %v570_v63  ;;  %v3004_v7 = vpop.eup %3003 }
 0x150   : > { %3019 = vrsqrt.f32 %v607_v60  ;;  %v655_v8 = vmul.f32 %v3761_v55, %v633_v0  ;;  %v858_v34 = vadd.f32 1.0, %v3004_v7 }
 0x151   : > { %v3006_v18 = vpop.eup %3005  ;;  %v608_v20 = vadd.f32 1e-05, %v592_v4  ;;  %v609_v25 = vadd.f32 1e-05, %v593_v5  ;;  %3021 = vpow2.f32 %v2567_v61 }
 0x152   : > { %v3008_v21 = vpop.eup %3007  ;;  %v572_v12 = vpop.xlane.xlu1 %571  ;;  %v634_v23 = vmul.f32 %v3006_v18, %v3579_v32  ;;  %v3774_v27 = vadd.f32 %v3769_v6, %v655_v8  ;;  %3023 = vpow2.f32 %v2568_v1  ;;  %v3805_v1 = vld [vmem:[%s3690_s17 + $0x48] sm:$0xff] }
 0x153   : > { %3025 = vrsqrt.f32 %v608_v20  ;;  %v594_v29 = vmul.f32 0.0078125, %v572_v12  ;;  %v635_v14 = vmul.f32 %v3008_v21, %v3575_v26  ;;  %v574_v15 = vpop.xlane.xlu0 %573  ;;  %v2570_v21 = vmul.f32 -1.442695, %v3805_v1 }
 0x154   : > { %v656_v30 = vmul.f32 %v3761_v55, %v634_v23  ;;  %v2545_v31 = vmul.f32 -1.442695, %v3774_v27  ;;  %3027 = vrcp.f32 %v857_v17  ;;  %v595_v44 = vmul.f32 0.0078125, %v574_v15 }
 0x155   : > { %v3010_v35 = vpop.eup %3009  ;;  %3029 = vrsqrt.f32 %v609_v25  ;;  %v610_v32 = vadd.f32 1e-05, %v594_v29  ;;  %v657_v36 = vmul.f32 %v3761_v55, %v635_v14 }
 0x156   : > { %v3012_v38 = vpop.eup %3011  ;;  %v576_v39 = vpop.xlane.xlu1 %575  ;;  %v3785_v42 = vadd.f32 %v3769_v6, %v656_v30  ;;  %3031 = vpow2.f32 %v2545_v31  ;;  %v636_v26 = vmul.f32 %v3010_v35, %v3581_v33 }
 0x157   : > { %v3788_v43 = vpop.eup %3013  ;;  %3033 = vrsqrt.f32 %v610_v32  ;;  %v596_v45 = vmul.f32 0.0078125, %v576_v39  ;;  %v3791_v46 = vadd.f32 %v3769_v6, %v657_v36  ;;  %v637_v54 = vmul.f32 %v3012_v38, %v3587_v40  ;;  %v578_v5 = vpop.xlane.xlu0 %577 }
 0x158   : > { %v3793_v47 = vpop.eup %3015  ;;  %v2546_v51 = vmul.f32 -1.442695, %v3785_v42  ;;  %v658_v52 = vmul.f32 %v3761_v55, %v636_v26  ;;  %3035 = vrcp.f32 %v858_v34  ;;  %v611_v40 = vadd.f32 1e-05, %v595_v44  ;;  %v3829_v26 = vld [vmem:[%s3690_s17 + $0x50] sm:$0xff] }
 0x159   : > { %v3018_v58 = vpop.eup %3017  ;;  %v612_v33 = vadd.f32 1e-05, %v596_v45  ;;  %v2547_v59 = vmul.f32 -1.442695, %v3791_v46  ;;  %3037 = vpow2.f32 %v2569_v37  ;;  %v659_v0 = vmul.f32 %v3761_v55, %v637_v54 }
 0x15a   : > { %v3020_v60 = vpop.eup %3019  ;;  %v580_v61 = vpop.xlane.xlu1 %579  ;;  %3039 = vpow2.f32 %v2546_v51  ;;  %v3800_v62 = vadd.f32 %v3769_v6, %v658_v52  ;;  %v638_v63 = vmul.f32 %v3018_v58, %v3589_v41  ;;  %v597_v23 = vmul.f32 0.0078125, %v578_v5 }
 0x15b   : > { %v3807_v4 = vpop.eup %3021  ;;  %3041 = vrsqrt.f32 %v612_v33  ;;  %v598_v7 = vmul.f32 0.0078125, %v580_v61  ;;  %v3814_v20 = vadd.f32 %v3769_v6, %v659_v0  ;;  %v639_v41 = vmul.f32 %v3020_v60, %v3595_v48  ;;  %v582_v58 = vpop.xlane.xlu0 %581 }
 0x15c   : > { %v3809_v8 = vpop.eup %3023  ;;  %v2548_v17 = vmul.f32 -1.442695, %v3800_v62  ;;  %v660_v18 = vmul.f32 %v3761_v55, %v638_v63  ;;  %3043 = vpow2.f32 %v2547_v59  ;;  %v2571_v60 = vmul.f32 -1.442695, %v3829_v26 }
 0x15d   : > { %v3026_v25 = vpop.eup %3025  ;;  %v614_v31 = vadd.f32 1e-05, %v598_v7  ;;  %v2549_v48 = vmul.f32 -1.442695, %v3814_v20  ;;  %v661_v32 = vmul.f32 %v3761_v55, %v639_v41  ;;  %v599_v7 = vmul.f32 0.0078125, %v582_v58 }
 0x15e   : > { %v3818_v12 = vpop.eup %3027  ;;  %v584_v29 = vpop.xlane.xlu1 %583  ;;  %3045 = vpow2.f32 %v2548_v17  ;;  %v3821_v14 = vadd.f32 %v3769_v6, %v660_v18  ;;  %v640_v15 = vmul.f32 %v3026_v25, %v3598_v49  ;;  %v613_v49 = vadd.f32 1e-05, %v597_v23  ;;  %v3845_v17 = vld [vmem:[%s3690_s17 + $0x58] sm:$0xff] }
 0x15f   : > { %v3030_v30 = vpop.eup %3029  ;;  %3047 = vrsqrt.f32 %v611_v40  ;;  %v600_v38 = vmul.f32 0.0078125, %v584_v29  ;;  %v3838_v33 = vadd.f32 %v3769_v6, %v661_v32 }
 0x160   : > { %v3032_v34 = vpop.eup %3031  ;;  %v2550_v35 = vmul.f32 -1.442695, %v3821_v14  ;;  %v662_v36 = vmul.f32 %v3761_v55, %v640_v15  ;;  %3049 = vpow2.f32 %v2570_v21  ;;  %v641_v59 = vmul.f32 %v3030_v30, %v3605_v56 }
 0x161   : > { %v3034_v37 = vpop.eup %3033  ;;  %v741_v39 = vadd.f32 1.0, %v3032_v34  ;;  %v616_v63 = vadd.f32 1e-05, %v600_v38  ;;  %v2551_v41 = vmul.f32 -1.442695, %v3838_v33 }
 0x162   : > { %v3831_v44 = vpop.eup %3035  ;;  %3051 = vpow2.f32 %v2550_v35  ;;  %v3834_v45 = vadd.f32 %v3769_v6, %v662_v36  ;;  %v642_v51 = vmul.f32 %v3034_v37, %v3608_v57  ;;  %v663_v56 = vmul.f32 %v3761_v55, %v641_v59 }
 0x163   : > { %v3038_v52 = vpop.eup %3037  ;;  %3053 = vrsqrt.f32 %v614_v31  ;;  %v2572_v30 = vmul.f32 -1.442695, %v3845_v17  ;;  %v615_v34 = vadd.f32 1e-05, %v599_v7  ;;  %v859_v35 = vadd.f32 1.0, %v3807_v4 }
 0x164   : > { %v3040_v54 = vpop.eup %3039  ;;  %3055 = vpow2.f32 %v2549_v48  ;;  %v2552_v57 = vmul.f32 -1.442695, %v3834_v45  ;;  %v664_v40 = vmul.f32 %v3761_v55, %v642_v51  ;;  %v3856_v32 = vadd.f32 %v3769_v6, %v663_v56 }
 0x165   : > { %v3042_v61 = vpop.eup %3041  ;;  %v742_v0 = vadd.f32 1.0, %v3040_v54  ;;  %3057 = vrcp.f32 %v741_v39  ;;  %v903_v4 = vmul.f32 %v3788_v43, %v3737_v9 }
 0x166   : > { %3059 = vrsqrt.f32 %v613_v49  ;;  %v3044_v5 = vpop.eup %3043  ;;  %v644_v29 = vmul.f32 %v3042_v61, %v3624_v3  ;;  %v3851_v15 = vadd.f32 %v3769_v6, %v664_v40  ;;  %v860_v3 = vadd.f32 1.0, %v3809_v8  ;;  %v3872_v61 = vld [vmem:[%s3690_s17 + $0x68] sm:$0xff] }
 0x167   : > { %3061 = vrcp.f32 %v742_v0  ;;  %v743_v21 = vadd.f32 1.0, %v3044_v5  ;;  %v2553_v59 = vmul.f32 -1.442695, %v3856_v32 }
 0x168   : > { %v3046_v18 = vpop.eup %3045  ;;  %3063 = vpow2.f32 %v2571_v60  ;;  %v666_v38 = vmul.f32 %v3761_v55, %v644_v29  ;;  %v2554_v49 = vmul.f32 -1.442695, %v3851_v15  ;;  %v3869_v60 = vld [vmem:[%s3690_s17 + $0x60] sm:$0xff] }
 0x169   : > { %v3048_v25 = vpop.eup %3047  ;;  %3065 = vrsqrt.f32 %v616_v63  ;;  %v744_v23 = vadd.f32 1.0, %v3046_v18  ;;  %v2573_v18 = vmul.f32 -1.442695, %v3869_v60 }
 0x16a   : > { %3067 = vpow2.f32 %v2552_v57  ;;  %v3050_v31 = vpop.eup %3049  ;;  %v643_v36 = vmul.f32 %v3048_v25, %v3621_v2  ;;  %v904_v2 = vmul.f32 %v3793_v47, %v3740_v10  ;;  %v861_v57 = vadd.f32 1.0, %v3038_v52 }
 0x16b   : > { %3069 = vrcp.f32 %v744_v23  ;;  %v3875_v9 = vadd.f32 %v3769_v6, %v666_v38 }
 0x16c   : > { %v3052_v48 = vpop.eup %3051  ;;  %3071 = vpow2.f32 %v2551_v41  ;;  %v665_v8 = vmul.f32 %v3761_v55, %v643_v36  ;;  %v920_v7 = vpack.c.bf16 %v904_v2, %v903_v4  ;;  %v2574_v41 = vmul.f32 -1.442695, %v3872_v61 }
 0x16d   : > { %v3054_v37 = vpop.eup %3053  ;;  %3073 = vrcp.f32 %v743_v21  ;;  %v746_v54 = vadd.f32 1.0, %v3052_v48  ;;  %v906_v48 = vmul.f32 %v3831_v44, %v3749_v22 }
 0x16e   : > { %v3056_v39 = vpop.eup %3055  ;;  %3075 = vpow2.f32 %v2572_v30  ;;  %v646_v40 = vmul.f32 %v3054_v37, %v3637_v11  ;;  %v3883_v25 = vadd.f32 %v3769_v6, %v665_v8  ;;  %v2556_v11 = vmul.f32 -1.442695, %v3875_v9 }
 0x16f   : > { %v3058_v51 = vpop.eup %3057  ;;  %3077 = vrsqrt.f32 %v615_v34  ;;  %v745_v0 = vadd.f32 1.0, %v3056_v39  ;;  %v905_v34 = vmul.f32 %v3818_v12, %v3745_v19 }
 0x170   : > { %v3060_v58 = vpop.eup %3059  ;;  %3079 = vrcp.f32 %v859_v35  ;;  %v789_v10 = vmul.f32 %v3058_v51, %v3774_v27  ;;  %v668_v29 = vmul.f32 %v3761_v55, %v646_v40  ;;  %v2555_v36 = vmul.f32 -1.442695, %v3883_v25 }
 0x171   : > { %v3062_v63 = vpop.eup %3061  ;;  %3081 = vrcp.f32 %v860_v3  ;;  %v645_v27 = vmul.f32 %v3060_v58, %v3634_v16  ;;  %v3896_v3 = vld [vmem:[%s3690_s17 + $0x70] sm:$0xff]  ;;  %v922_v4 = vpack.c.bf16 %v906_v48, %v905_v34 }
 0x172   : > { %v3064_v43 = vpop.eup %3063  ;;  %v790_v47 = vmul.f32 %v3062_v63, %v3785_v42  ;;  %3083 = vpow2.f32 %v2554_v49  ;;  %v862_v42 = vadd.f32 1.0, %v3050_v31  ;;  %v3900_v44 = vadd.f32 %v3769_v6, %v668_v29  ;;  %v3903_v49 = vld [vmem:[%s3690_s17 + $0x78] sm:$0xff]  ;;  %s2696_s17 = sshll.u32 %s3477_s25, 12  ;;  %s4807_s25 = scalar_lea.sflag [#allocation3], %s421_s20 }
 0x173   : > { %v3066_v5 = vpop.eup %3065  ;;  %3085 = vrcp.f32 %v746_v54  ;;  %v667_v37 = vmul.f32 %v3761_v55, %v645_v27  ;;  %v863_v19 = vadd.f32 1.0, %v3064_v43  ;;  %v2575_v54 = vmul.f32 -1.442695, %v3896_v3  ;;  %s4797_s23 = scalar_lea.hbm %s4860_s12, %s2696_s17 }
 0x174   : > { %v3068_v56 = vpop.eup %3067  ;;  %v917_v52 = vpack.c.bf16 %v790_v47, %v789_v10  ;;  %3087 = vpow2.f32 %v2553_v59 }
 0x175   : > { %v3070_v21 = vpop.eup %3069  ;;  %3089 = vrcp.f32 %v745_v0  ;;  %v748_v16 = vadd.f32 1.0, %v3068_v56  ;;  %v3908_v8 = vadd.f32 %v3769_v6, %v667_v37  ;;  %v2576_v0 = vmul.f32 -1.442695, %v3903_v49 }
 0x176   : > { %v3072_v23 = vpop.eup %3071  ;;  %1170 = vmatmul.mubr.bf16.vlgmr.msra.gmra.mrb[0].mxu0 %v917_v52  ;;  %3091 = vrcp.f32 %v861_v57  ;;  %v792_v35 = vmul.f32 %v3070_v21, %v3800_v62  ;;  %v648_v62 = vmul.f32 %v3066_v5, %v3653_v24  ;;  %v2558_v24 = vmul.f32 -1.442695, %v3900_v44 }
 0x177   : > { %v3074_v30 = vpop.eup %3073  ;;  %1179 = vmatprep.mubr.bf16.mxu0 %v920_v7  ;;  %3093 = vpow2.f32 %v2573_v18  ;;  %v747_v39 = vadd.f32 1.0, %v3072_v23  ;;  %v2557_v18 = vmul.f32 -1.442695, %v3908_v8 }
 0x178   : > { %v3076_v31 = vpop.eup %3075  ;;  %3095 = vpow2.f32 %v2574_v41  ;;  %v791_v22 = vmul.f32 %v3074_v30, %v3791_v46  ;;  %v670_v43 = vmul.f32 %v3761_v55, %v648_v62 }
 0x179   : > { %v3078_v38 = vpop.eup %3077  ;;  %3097 = vrcp.f32 %v862_v42  ;;  %v864_v2 = vadd.f32 1.0, %v3076_v31 }
 0x17a   : > { %v3080_v12 = vpop.eup %3079  ;;  %3099 = vpow2.f32 %v2556_v11  ;;  %v919_v59 = vpack.c.bf16 %v792_v35, %v791_v22  ;;  %v647_v46 = vmul.f32 %v3078_v38, %v3650_v13 }
 0x17b   : > { %v3082_v51 = vpop.eup %3081  ;;  %3101 = vrcp.f32 %v748_v16  ;;  %v907_v47 = vmul.f32 %v3080_v12, %v3753_v50  ;;  %v3921_v50 = vadd.f32 %v3769_v6, %v670_v43 }
 0x17c   : > { %v3084_v58 = vpop.eup %3083  ;;  %3103 = vpow2.f32 %v2555_v36  ;;  %v908_v40 = vmul.f32 %v3082_v51, %v3756_v53  ;;  %v669_v41 = vmul.f32 %v3761_v55, %v647_v46 }
 0x17d   : > { %v3086_v63 = vpop.eup %3085  ;;  %3105 = vrcp.f32 %v747_v39  ;;  %v750_v5 = vadd.f32 1.0, %v3084_v58 }
 0x17e   : > { %v3088_v57 = vpop.eup %3087  ;;  %1180 = vmatmul.mubr.bf16.gmra.mrb[4].mxu0 %v919_v59  ;;  %3107 = vrcp.f32 %v863_v19  ;;  %v794_v7 = vmul.f32 %v3086_v63, %v3821_v14  ;;  %v924_v42 = vpack.c.bf16 %v908_v40, %v907_v47  ;;  %v3924_v29 = vadd.f32 %v3769_v6, %v669_v41 }
 0x17f   : > { %v3090_v10 = vpop.eup %3089  ;;  %1189 = vmatprep.mubr.bf16.mxu0 %v922_v4  ;;  %3109 = vrcp.f32 %v864_v2  ;;  %v749_v52 = vadd.f32 1.0, %v3088_v57 }
 0x180   : > { %v3092_v13 = vpop.eup %3091  ;;  %3111 = vpow2.f32 %v2575_v54  ;;  %v793_v21 = vmul.f32 %v3090_v10, %v3814_v20  ;;  %v2560_v20 = vmul.f32 -1.442695, %v3921_v50  ;;  %v2559_v6 = vmul.f32 -1.442695, %v3924_v29 }
 0x181   : > { %v3094_v56 = vpop.eup %3093  ;;  %3113 = vpow2.f32 %v2576_v0  ;;  %v909_v16 = vmul.f32 %v3092_v13, %v3777_v28 }
 0x182   : > { %v3096_v27 = vpop.eup %3095  ;;  %3115 = vpow2.f32 %v2558_v24  ;;  %v921_v14 = vpack.c.bf16 %v794_v7, %v793_v21  ;;  %v865_v11 = vadd.f32 1.0, %v3094_v56 }
 0x183   : > { %v3098_v53 = vpop.eup %3097  ;;  %3117 = vrcp.f32 %v750_v5  ;;  %v866_v30 = vadd.f32 1.0, %v3096_v27 }
 0x184   : > { %v3100_v23 = vpop.eup %3099  ;;  %3119 = vpow2.f32 %v2557_v18  ;;  %v910_v31 = vmul.f32 %v3098_v53, %v3805_v1 }
 0x185   : > { %v3102_v55 = vpop.eup %3101  ;;  %3121 = vrcp.f32 %v749_v52  ;;  %v752_v35 = vadd.f32 1.0, %v3100_v23 }
 0x186   : > { %v3104_v34 = vpop.eup %3103  ;;  %1190 = vmatmul.mubr.bf16.gmra.mrb[8].mxu0 %v921_v14  ;;  %v796_v37 = vmul.f32 %v3102_v55, %v3834_v45  ;;  %3123 = vrcp.f32 %v865_v11  ;;  %v926_v62 = vpack.c.bf16 %v910_v31, %v909_v16  ;;  %v967_v31 = vlaneseq }
 0x187   : > { %v3106_v48 = vpop.eup %3105  ;;  %1199 = vmatprep.mubr.bf16.mxu0 %v924_v42  ;;  %v751_v39 = vadd.f32 1.0, %v3104_v34  ;;  %3125 = vrcp.f32 %v866_v30 }
 0x188   : > { %v3108_v36 = vpop.eup %3107  ;;  %v795_v12 = vmul.f32 %v3106_v48, %v3838_v33  ;;  %3127 = vpow2.f32 %v2560_v20 }
 0x189   : > { %v3110_v38 = vpop.eup %3109  ;;  %3129 = vrcp.f32 %v752_v35  ;;  %v911_v58 = vmul.f32 %v3108_v36, %v3829_v26 }
 0x18a   : > { %v3112_v19 = vpop.eup %3111  ;;  %v923_v51 = vpack.c.bf16 %v796_v37, %v795_v12  ;;  %3131 = vpow2.f32 %v2559_v6  ;;  %v912_v59 = vmul.f32 %v3110_v38, %v3845_v17 }
 0x18b   : > { %v3114_v22 = vpop.eup %3113  ;;  %3133 = vrcp.f32 %v751_v39  ;;  %v867_v4 = vadd.f32 1.0, %v3112_v19  ;;  %v965_v39 = vld [vmem:[%s4853_s5] sm:$0x3] }
 0x18c   : > { %v3116_v28 = vpop.eup %3115  ;;  %v868_v2 = vadd.f32 1.0, %v3114_v22  ;;  %v928_v43 = vpack.c.bf16 %v912_v59, %v911_v58 }
 0x18d   : > { %v3118_v1 = vpop.eup %3117  ;;  %v754_v33 = vadd.f32 1.0, %v3116_v28  ;;  %3135 = vrcp.f32 %v867_v4 }
 0x18e   : > { %v3120_v45 = vpop.eup %3119  ;;  %1200 = vmatmul.mubr.bf16.gmra.mrb[12].mxu0 %v923_v51  ;;  %v798_v46 = vmul.f32 %v3118_v1, %v3851_v15  ;;  %3137 = vrcp.f32 %v868_v2 }
 0x18f   : > { %v3122_v54 = vpop.eup %3121  ;;  %1209 = vmatprep.mubr.bf16.mxu0 %v926_v62  ;;  %v753_v63 = vadd.f32 1.0, %v3120_v45  ;;  %3139 = vrcp.f32 %v754_v33 }
 0x190   : > { %v3124_v0 = vpop.eup %3123  ;;  %v797_v57 = vmul.f32 %v3122_v54, %v3856_v32 }
 0x191   : > { %v3126_v24 = vpop.eup %3125  ;;  %3141 = vrcp.f32 %v753_v63  ;;  %v913_v17 = vmul.f32 %v3124_v0, %v3869_v60 }
 0x192   : > { %v3128_v10 = vpop.eup %3127  ;;  %v925_v47 = vpack.c.bf16 %v798_v46, %v797_v57  ;;  %v914_v15 = vmul.f32 %v3126_v24, %v3872_v61 }
 0x193   : > { %v3130_v40 = vpop.eup %3129  ;;  %v756_v13 = vadd.f32 1.0, %v3128_v10 }
 0x194   : > { %v3132_v5 = vpop.eup %3131  ;;  %v800_v7 = vmul.f32 %v3130_v40, %v3875_v9  ;;  %v930_v56 = vpack.c.bf16 %v914_v15, %v913_v17 }
 0x195   : > { %v3134_v26 = vpop.eup %3133  ;;  %v755_v32 = vadd.f32 1.0, %v3132_v5  ;;  %3143 = vrcp.f32 %v756_v13 }
 0x196   : > { %1210 = vmatmul.mubr.bf16.gmra.mrb[16].mxu0 %v925_v47  ;;  %v799_v18 = vmul.f32 %v3134_v26, %v3883_v25 }
 0x197   : > { %1219 = vmatprep.mubr.bf16.mxu0 %v928_v43  ;;  %v3136_v41 = vpop.eup %3135  ;;  %3145 = vrcp.f32 %v755_v32 }
 0x198   : > { %v3138_v52 = vpop.eup %3137  ;;  %v927_v27 = vpack.c.bf16 %v800_v7, %v799_v18  ;;  %v915_v60 = vmul.f32 %v3136_v41, %v3896_v3 }
 0x199   : > { %v3140_v21 = vpop.eup %3139  ;;  %v916_v61 = vmul.f32 %v3138_v52, %v3903_v49 }
 0x19a   : > { %v802_v42 = vmul.f32 %v3140_v21, %v3900_v44 }
 0x19b   : > { %v3142_v53 = vpop.eup %3141  ;;  %v932_v23 = vpack.c.bf16 %v916_v61, %v915_v60 }
 0x19c   : > { %v801_v9 = vmul.f32 %v3142_v53, %v3908_v8 }
 0x19e   : > { %1220 = vmatmul.mubr.bf16.gmra.mrb[20].mxu0 %v927_v27  ;;  %v929_v25 = vpack.c.bf16 %v802_v42, %v801_v9 }
 0x19f   : > { %1229 = vmatprep.mubr.bf16.mxu0 %v930_v56  ;;  %v3144_v14 = vpop.eup %3143 }
 0x1a0   : > { %v804_v55 = vmul.f32 %v3144_v14, %v3921_v50 }
 0x1a1   : > { %v3146_v11 = vpop.eup %3145 }
 0x1a2   : > { %v803_v30 = vmul.f32 %v3146_v11, %v3924_v29  ;;  %v968_v29 = vshrl.u32 %v967_v31, 7 }
 0x1a4   : > { %v931_v34 = vpack.c.bf16 %v804_v55, %v803_v30  ;;  %v3968_v6 = vsub.s32 0, %v968_v29  ;;  %v3975_v19 = vsub.s32 1, %v968_v29 }
 0x1a6   : > { %1230 = vmatmul.mubr.bf16.gmra.mrb[24].mxu0 %v929_v25  ;;  %v3978_v12 = vrot.slane %v965_v39, %v3968_v6  ;;  %v3981_v22 = vrot.slane %v965_v39, %v3975_v19 }
 0x1a7   : > { %1239 = vmatprep.mubr.bf16.mxu0 %v932_v23 }
 0x1ae   : > { %1240 = vmatmul.mubr.bf16.gmra.mrb[28].mxu0 %v931_v34 }
 0x249   : > { %v3946_v20 = vpop.f32.mrb[0].mxu0 }
 0x24a   : > { %v3948_v3 = vpop.f32.mrb[1].mxu0  ;;  %v4054_v31 = vadd.f32 %v3946_v20, %v3978_v12 }
 0x24b   : > { %v3950_v49 = vpop.f32.mrb[2].mxu0  ;;  %v4058_v29 = vadd.f32 %v3948_v3, %v3981_v22 }
 0x24c   : > { %v3952_v44 = vpop.f32.mrb[3].mxu0 }
 0x251   : > { %v3954_v8 = vpop.f32.mrb[4].mxu0 }
 0x252   : > { %v3956_v48 = vpop.f32.mrb[5].mxu0  ;;  %v4077_v3 = vadd.f32 %v3954_v8, %v3978_v12 }
 0x253   : > { %v3958_v16 = vpop.f32.mrb[6].mxu0 }
 0x254   : > { %v3960_v50 = vpop.f32.mrb[7].mxu0 }
 0x259   : > { %v3962_v35 = vpop.f32.mrb[8].mxu0 }
 0x25a   : > { %v3964_v36 = vpop.f32.mrb[9].mxu0 }
 0x25b   : > { %v3966_v37 = vpop.f32.mrb[10].mxu0 }
 0x25c   : > { %v3970_v38 = vpop.f32.mrb[11].mxu0 }
 0x261   : > { %v1201_v62 = vpop.f32.mrb[12].mxu0 }
 0x262   : > { %v3984_v28 = vadd.f32 %v1201_v62, %v3978_v12  ;;  %v1203_v51 = vpop.f32.mrb[13].mxu0 }
 0x263   : > { %v3987_v1 = vadd.f32 %v1203_v51, %v3981_v22  ;;  %v1205_v4 = vpop.f32.mrb[14].mxu0  ;;  %v4067_v51 = vadd.f32 %v3950_v49, %v3978_v12  ;;  %v1252_v49 = vadd.f32 %v4058_v29, %v4054_v31 }
 0x264   : > { %v3990_v45 = vadd.f32 %v1205_v4, %v3978_v12  ;;  %v1207_v2 = vpop.f32.mrb[15].mxu0  ;;  %v4071_v4 = vadd.f32 %v3952_v44, %v3981_v22  ;;  %v4087_v44 = vadd.f32 %v3958_v16, %v3978_v12 }
 0x265   : > { %v3993_v54 = vadd.f32 %v1207_v2, %v3981_v22  ;;  %v4081_v2 = vadd.f32 %v3956_v48, %v3981_v22  ;;  %v4097_v48 = vadd.f32 %v3962_v35, %v3978_v12 }
 0x266   : > { %v1255_v8 = vadd.f32 %v4071_v4, %v4067_v51 }
 0x267   : > { %v1258_v16 = vadd.f32 %v4081_v2, %v4077_v3 }
 0x269   : > { %v1211_v58 = vpop.f32.mrb[16].mxu0 }
 0x26a   : > { %v3996_v59 = vadd.f32 %v1211_v58, %v3978_v12  ;;  %v1213_v33 = vpop.f32.mrb[17].mxu0  ;;  %v4091_v58 = vadd.f32 %v3960_v50, %v3981_v22  ;;  %v4107_v50 = vadd.f32 %v3966_v37, %v3978_v12  ;;  %v2915_v37 = vld [vmem:[%s4856_s8 + $0x4] ss:$8 sps:$4 sm:$0xff]  }
 0x26b   : > { %v3999_v46 = vadd.f32 %v1213_v33, %v3981_v22  ;;  %v1215_v63 = vpop.f32.mrb[18].mxu0  ;;  %v4101_v33 = vadd.f32 %v3964_v36, %v3981_v22  ;;  %2697 = vmatprep.subr.bf16.mxu1 %v2915_v37  ;;  %2039 = vmatprep.subr.bf16.mxu0 %v2915_v37 }
 0x26c   : > { %v4002_v0 = vadd.f32 %v1215_v63, %v3978_v12  ;;  %v1217_v57 = vpop.f32.mrb[19].mxu0  ;;  %v4111_v63 = vadd.f32 %v3970_v38, %v3981_v22  ;;  %v1261_v35 = vadd.f32 %v4091_v58, %v4087_v44  ;;  %v2917_v38 = vld [vmem:[%s4856_s8] ss:$8 sps:$4 sm:$0xff]  }
 0x26d   : > { %v4005_v24 = vadd.f32 %v1217_v57, %v3981_v22  ;;  %v1276_v43 = vadd.f32 %v3999_v46, %v3996_v59  ;;  %v1264_v36 = vadd.f32 %v4101_v33, %v4097_v48  ;;  %2713 = vmatpush1.bf16.msra.mxu1 %v2917_v38  ;;  %2040 = vmatpush1.bf16.msra.mxu0 %v2917_v38 }
 0x26e   : > { %v1267_v57 = vadd.f32 %v4111_v63, %v4107_v50 }
 0x26f   : > { %1277 = vadd.xlane.f32.xlu0 %v1276_v43  ;;  %v1279_v10 = vadd.f32 %v4005_v24, %v4002_v0  ;;  %v2921_v43 = vld [vmem:[%s4856_s8 + $0x24] ss:$8 sps:$4 sm:$0xff]  }
 0x271   : > { %1280 = vadd.xlane.f32.xlu1 %v1279_v10  ;;  %v1221_v47 = vpop.f32.mrb[20].mxu0  ;;  %v2923_v10 = vld [vmem:[%s4856_s8 + $0x20] ss:$8 sps:$4 sm:$0xff]  }
 0x272   : > { %v4012_v40 = vadd.f32 %v1221_v47, %v3978_v12  ;;  %v1223_v5 = vpop.f32.mrb[21].mxu0 }
 0x273   : > { %v4015_v26 = vadd.f32 %v1223_v5, %v3981_v22  ;;  %v1225_v17 = vpop.f32.mrb[22].mxu0 }
 0x274   : > { %v4018_v15 = vadd.f32 %v1225_v17, %v3978_v12  ;;  %v1227_v13 = vpop.f32.mrb[23].mxu0 }
 0x275   : > { %v4021_v7 = vadd.f32 %v1227_v13, %v3981_v22  ;;  %v1282_v32 = vadd.f32 %v4015_v26, %v4012_v40 }
 0x277   : > { %1283 = vadd.xlane.f32.xlu0 %v1282_v32  ;;  %v1285_v18 = vadd.f32 %v4021_v7, %v4018_v15 }
 0x279   : > { %1286 = vadd.xlane.f32.xlu1 %v1285_v18  ;;  %v1231_v41 = vpop.f32.mrb[24].mxu0 }
 0x27a   : > { %v4028_v56 = vadd.f32 %v1231_v41, %v3978_v12  ;;  %v1233_v52 = vpop.f32.mrb[25].mxu0 }
 0x27b   : > { %v4031_v27 = vadd.f32 %v1233_v52, %v3981_v22  ;;  %v1235_v21 = vpop.f32.mrb[26].mxu0 }
 0x27c   : > { %v4034_v53 = vadd.f32 %v1235_v21, %v3978_v12  ;;  %v1237_v60 = vpop.f32.mrb[27].mxu0 }
 0x27d   : > { %v4037_v61 = vadd.f32 %v1237_v60, %v3981_v22  ;;  %v1288_v42 = vadd.f32 %v4031_v27, %v4028_v56 }
 0x27f   : > { %1289 = vadd.xlane.f32.xlu0 %v1288_v42  ;;  %v1291_v9 = vadd.f32 %v4037_v61, %v4034_v53 }
 0x281   : > { %1292 = vadd.xlane.f32.xlu1 %v1291_v9  ;;  %v1241_v23 = vpop.f32.mrb[28].mxu0 }
 0x282   : > { %v4044_v25 = vadd.f32 %v1241_v23, %v3978_v12  ;;  %v1243_v14 = vpop.f32.mrb[29].mxu0 }
 0x283   : > { %v4047_v11 = vadd.f32 %v1243_v14, %v3981_v22  ;;  %v1245_v55 = vpop.f32.mrb[30].mxu0 }
 0x284   : > { %v4050_v30 = vadd.f32 %v1245_v55, %v3978_v12  ;;  %v1247_v34 = vpop.f32.mrb[31].mxu0  ;;  %v2918_v12 = vld [vmem:[%s4856_s8 + $0x14] ss:$8 sps:$4 sm:$0xff]  }
 0x285   : > { %v4061_v39 = vadd.f32 %v1247_v34, %v3981_v22  ;;  %v1294_v62 = vadd.f32 %v4047_v11, %v4044_v25  ;;  %v2920_v22 = vld [vmem:[%s4856_s8 + $0x10] ss:$8 sps:$4 sm:$0xff]   ;;  %2698 = vmatprep.subr.bf16.mxu1 %v2918_v12  ;;  %2041 = vmatprep.subr.bf16.mxu0 %v2918_v12 }
 0x286   : > { %2714 = vmatpush1.bf16.msra.mxu1 %v2920_v22  ;;  %2042 = vmatpush1.bf16.msra.mxu0 %v2920_v22 }
 0x287   : > { %1295 = vadd.xlane.f32.xlu0 %v1294_v62  ;;  %v1297_v20 = vadd.f32 %v4061_v39, %v4050_v30  ;;  %2699 = vmatprep.subr.bf16.mxu1 %v2921_v43  ;;  %v1270_v62 = vadd.f32 %v3987_v1, %v3984_v28 }
 0x288   : > { %2043 = vmatprep.subr.bf16.mxu0 %v2921_v43 }
 0x289   : > { %1298 = vadd.xlane.f32.xlu1 %v1297_v20  ;;  %v1273_v20 = vadd.f32 %v3993_v54, %v3990_v45 }
 0x28a   : > { %2715 = vmatpush1.bf16.msra.mxu1 %v2923_v10  ;;  %2044 = vmatpush1.bf16.msra.mxu0 %v2923_v10 }
 0x28b   : > { %1253 = vadd.xlane.f32.xlu0 %v1252_v49 }
 0x28d   : > { %1256 = vadd.xlane.f32.xlu1 %v1255_v8 }
 0x28f   : > { %1259 = vadd.xlane.f32.xlu0 %v1258_v16 }
 0x291   : > { %1262 = vadd.xlane.f32.xlu1 %v1261_v35 }
 0x293   : > { %1265 = vadd.xlane.f32.xlu0 %v1264_v36 }
 0x295   : > { %1268 = vadd.xlane.f32.xlu1 %v1267_v57 }
 0x2fc   : > { %v1278_v47 = vpop.xlane.xlu0 %1277 }
 0x2fd   : > { %v1309_v5 = vmul.f32 0.00390625, %v1278_v47 }
 0x2fe   : > { %v1281_v17 = vpop.xlane.xlu1 %1280 }
 0x2ff   : > { %v4138_v13 = vsub.f32 %v3996_v59, %v1309_v5  ;;  %v4141_v32 = vsub.f32 %v3999_v46, %v1309_v5  ;;  %v1310_v18 = vmul.f32 0.00390625, %v1281_v17 }
 0x301   : > { %v4144_v41 = vsub.f32 %v4002_v0, %v1310_v18  ;;  %v4147_v52 = vsub.f32 %v4005_v24, %v1310_v18  ;;  %v1365_v21 = vmul.f32 %v4138_v13, %v4138_v13  ;;  %v1366_v60 = vmul.f32 %v4141_v32, %v4141_v32 }
 0x303   : > { %v1405_v42 = vadd.f32 %v1366_v60, %v1365_v21  ;;  %v1367_v59 = vmul.f32 %v4144_v41, %v4144_v41  ;;  %v1368_v46 = vmul.f32 %v4147_v52, %v4147_v52 }
 0x304   : > { %v1284_v9 = vpop.xlane.xlu0 %1283 }
 0x305   : > { %v1311_v23 = vmul.f32 0.00390625, %v1284_v9  ;;  %1406 = vadd.xlane.f32.xlu0 %v1405_v42  ;;  %v1408_v0 = vadd.f32 %v1368_v46, %v1367_v59  ;;  %v2924_v46 = vld [vmem:[%s4856_s8 + $0x34] ss:$8 sps:$4 sm:$0xff]  }
 0x306   : > { %v1287_v14 = vpop.xlane.xlu1 %1286  ;;  %2700 = vmatprep.subr.bf16.mxu1 %v2924_v46  ;;  %2045 = vmatprep.subr.bf16.mxu0 %v2924_v46  ;;  %v2933_v46 = vld [vmem:[%s4856_s8 + $0x64] ss:$8 sps:$4 sm:$0xff]  }
 0x307   : > { %v4158_v24 = vsub.f32 %v4012_v40, %v1311_v23  ;;  %v4161_v55 = vsub.f32 %v4015_v26, %v1311_v23  ;;  %v1312_v34 = vmul.f32 0.00390625, %v1287_v14  ;;  %1409 = vadd.xlane.f32.xlu1 %v1408_v0  ;;  %v2926_v23 = vld [vmem:[%s4856_s8 + $0x30] ss:$8 sps:$4 sm:$0xff]  }
 0x308   : > { %2716 = vmatpush1.bf16.msra.mxu1 %v2926_v23  ;;  %2046 = vmatpush1.bf16.msra.mxu0 %v2926_v23 }
 0x309   : > { %v4168_v49 = vsub.f32 %v4018_v15, %v1312_v34  ;;  %v4171_v8 = vsub.f32 %v4021_v7, %v1312_v34  ;;  %1271 = vadd.xlane.f32.xlu0 %v1270_v62  ;;  %v1369_v40 = vmul.f32 %v4158_v24, %v4158_v24  ;;  %v1370_v26 = vmul.f32 %v4161_v55, %v4161_v55 }
 0x30b   : > { %1274 = vadd.xlane.f32.xlu1 %v1273_v20  ;;  %v1411_v16 = vadd.f32 %v1370_v26, %v1369_v40  ;;  %v1371_v35 = vmul.f32 %v4168_v49, %v4168_v49  ;;  %v1372_v36 = vmul.f32 %v4171_v8, %v4171_v8  ;;  %v2927_v26 = vld [vmem:[%s4856_s8 + $0x44] ss:$8 sps:$4 sm:$0xff]  }
 0x30c   : > { %v1290_v15 = vpop.xlane.xlu0 %1289  ;;  %2701 = vmatprep.subr.bf16.mxu1 %v2927_v26  ;;  %2047 = vmatprep.subr.bf16.mxu0 %v2927_v26 }
 0x30d   : > { %v1313_v57 = vmul.f32 0.00390625, %v1290_v15  ;;  %1412 = vadd.xlane.f32.xlu0 %v1411_v16  ;;  %v1414_v7 = vadd.f32 %v1372_v36, %v1371_v35  ;;  %v2929_v16 = vld [vmem:[%s4856_s8 + $0x40] ss:$8 sps:$4 sm:$0xff]  }
 0x30e   : > { %v1293_v37 = vpop.xlane.xlu1 %1292  ;;  %2717 = vmatpush1.bf16.msra.mxu1 %v2929_v16  ;;  %2048 = vmatpush1.bf16.msra.mxu0 %v2929_v16 }
 0x30f   : > { %v4182_v38 = vsub.f32 %v4028_v56, %v1313_v57  ;;  %v4185_v12 = vsub.f32 %v4031_v27, %v1313_v57  ;;  %v1314_v22 = vmul.f32 0.00390625, %v1293_v37  ;;  %1415 = vadd.xlane.f32.xlu1 %v1414_v7 }
 0x311   : > { %v4188_v43 = vsub.f32 %v4034_v53, %v1314_v22  ;;  %v4191_v10 = vsub.f32 %v4037_v61, %v1314_v22  ;;  %v1373_v47 = vmul.f32 %v4182_v38, %v4182_v38  ;;  %v1374_v5 = vmul.f32 %v4185_v12, %v4185_v12 }
 0x313   : > { %v1417_v17 = vadd.f32 %v1374_v5, %v1373_v47  ;;  %v1375_v56 = vmul.f32 %v4188_v43, %v4188_v43  ;;  %v1376_v27 = vmul.f32 %v4191_v10, %v4191_v10 }
 0x314   : > { %v1296_v18 = vpop.xlane.xlu0 %1295 }
 0x315   : > { %v1315_v21 = vmul.f32 0.00390625, %v1296_v18  ;;  %1418 = vadd.xlane.f32.xlu0 %v1417_v17  ;;  %v1420_v53 = vadd.f32 %v1376_v27, %v1375_v56  ;;  %v2930_v56 = vld [vmem:[%s4856_s8 + $0x54] ss:$8 sps:$4 sm:$0xff]  }
 0x316   : > { %v1299_v60 = vpop.xlane.xlu1 %1298  ;;  %2702 = vmatprep.subr.bf16.mxu1 %v2930_v56  ;;  %2049 = vmatprep.subr.bf16.mxu0 %v2930_v56  ;;  %v2947_v56 = vld [vmem:[%s4856_s8 + $0xa0] ss:$8 sps:$4 sm:$0xff]  }
 0x317   : > { %v4202_v61 = vsub.f32 %v4044_v25, %v1315_v21  ;;  %v4205_v42 = vsub.f32 %v4047_v11, %v1315_v21  ;;  %v1316_v59 = vmul.f32 0.00390625, %v1299_v60  ;;  %1421 = vadd.xlane.f32.xlu1 %v1420_v53 }
 0x318   : > { %v1254_v9 = vpop.xlane.xlu0 %1253 }
 0x319   : > { %v4214_v0 = vsub.f32 %v4050_v30, %v1316_v59  ;;  %v4217_v25 = vsub.f32 %v4061_v39, %v1316_v59  ;;  %v1301_v14 = vmul.f32 0.00390625, %v1254_v9  ;;  %v1377_v11 = vmul.f32 %v4202_v61, %v4202_v61 }
 0x31a   : > { %v1257_v34 = vpop.xlane.xlu1 %1256  ;;  %v1378_v62 = vmul.f32 %v4205_v42, %v4205_v42 }
 0x31b   : > { %v4224_v20 = vsub.f32 %v4054_v31, %v1301_v14  ;;  %v4227_v30 = vsub.f32 %v4058_v29, %v1301_v14  ;;  %v1302_v39 = vmul.f32 0.00390625, %v1257_v34  ;;  %v1379_v40 = vmul.f32 %v4214_v0, %v4214_v0 }
 0x31c   : > { %v1260_v35 = vpop.xlane.xlu0 %1259  ;;  %v1423_v36 = vadd.f32 %v1378_v62, %v1377_v11  ;;  %v1380_v31 = vmul.f32 %v4217_v25, %v4217_v25 }
 0x31d   : > { %v4240_v29 = vsub.f32 %v4067_v51, %v1302_v39  ;;  %v4243_v15 = vsub.f32 %v4071_v4, %v1302_v39  ;;  %v1303_v57 = vmul.f32 0.00390625, %v1260_v35  ;;  %v1349_v7 = vmul.f32 %v4224_v20, %v4224_v20 }
 0x31e   : > { %1424 = vadd.xlane.f32.xlu0 %v1423_v36  ;;  %v1263_v37 = vpop.xlane.xlu1 %1262  ;;  %v1426_v22 = vadd.f32 %v1380_v31, %v1379_v40  ;;  %v1350_v47 = vmul.f32 %v4227_v30, %v4227_v30 }
 0x31f   : > { %v4250_v5 = vsub.f32 %v4077_v3, %v1303_v57  ;;  %v4253_v51 = vsub.f32 %v4081_v2, %v1303_v57  ;;  %v1304_v4 = vmul.f32 0.00390625, %v1263_v37  ;;  %v1351_v17 = vmul.f32 %v4240_v29, %v4240_v29  ;;  %v2932_v3 = vld [vmem:[%s4856_s8 + $0x50] ss:$8 sps:$4 sm:$0xff]   ;;  %v2939_v37 = vld [vmem:[%s4856_s8 + $0x84] ss:$8 sps:$4 sm:$0xff]  }
 0x320   : > { %1427 = vadd.xlane.f32.xlu1 %v1426_v22  ;;  %v1266_v27 = vpop.xlane.xlu0 %1265  ;;  %v1381_v18 = vadd.f32 %v1350_v47, %v1349_v7  ;;  %v1352_v21 = vmul.f32 %v4243_v15, %v4243_v15  ;;  %2718 = vmatpush1.bf16.msra.mxu1 %v2932_v3  ;;  %v2938_v57 = vld [vmem:[%s4856_s8 + $0x70] ss:$8 sps:$4 sm:$0xff]   ;;  %v2941_v22 = vld [vmem:[%s4856_s8 + $0x80] ss:$8 sps:$4 sm:$0xff]   ;;  %v2942_v47 = vld [vmem:[%s4856_s8 + $0x94] ss:$8 sps:$4 sm:$0xff]  }
 0x321   : > { %v4266_v2 = vsub.f32 %v4087_v44, %v1304_v4  ;;  %v4269_v53 = vsub.f32 %v4091_v58, %v1304_v4  ;;  %v1305_v60 = vmul.f32 0.00390625, %v1266_v27  ;;  %v1353_v59 = vmul.f32 %v4250_v5, %v4250_v5  ;;  %v2935_v58 = vld [vmem:[%s4856_s8 + $0x60] ss:$8 sps:$4 sm:$0xff]   ;;  %2703 = vmatprep.subr.bf16.mxu1 %v2933_v46  ;;  %2050 = vmatpush1.bf16.msra.mxu0 %v2932_v3  ;;  %v2944_v4 = vld [vmem:[%s4856_s8 + $0x90] ss:$8 sps:$4 sm:$0xff]  }
 0x322   : > { %1382 = vadd.xlane.f32.xlu0 %v1381_v18  ;;  %v1269_v9 = vpop.xlane.xlu1 %1268  ;;  %v1384_v23 = vadd.f32 %v1352_v21, %v1351_v17  ;;  %v1354_v44 = vmul.f32 %v4253_v51, %v4253_v51  ;;  %2051 = vmatprep.subr.bf16.mxu0 %v2933_v46  ;;  %v2945_v17 = vld [vmem:[%s4856_s8 + $0xa4] ss:$8 sps:$4 sm:$0xff]   ;;  %v2948_v27 = vld [vmem:[%s4856_s8 + $0xb4] ss:$8 sps:$4 sm:$0xff]   ;;  %v2950_v18 = vld [vmem:[%s4856_s8 + $0xb0] ss:$8 sps:$4 sm:$0xff]  }
 0x323   : > { %v4282_v14 = vsub.f32 %v4097_v48, %v1305_v60  ;;  %v4285_v11 = vsub.f32 %v4101_v33, %v1305_v60  ;;  %v1306_v34 = vmul.f32 0.00390625, %v1269_v9  ;;  %v1355_v62 = vmul.f32 %v4266_v2, %v4266_v2  ;;  %v2951_v21 = vld [vmem:[%s4856_s8 + $0xc4] ss:$8 sps:$4 sm:$0xff]   ;;  %v2953_v3 = vld [vmem:[%s4856_s8 + $0xc0] ss:$8 sps:$4 sm:$0xff]  }
 0x324   : > { %1385 = vadd.xlane.f32.xlu1 %v1384_v23  ;;  %v1387_v39 = vadd.f32 %v1354_v44, %v1353_v59  ;;  %v1356_v40 = vmul.f32 %v4269_v53, %v4269_v53  ;;  %2719 = vmatpush1.bf16.msra.mxu1 %v2935_v58  ;;  %v2954_v60 = vld [vmem:[%s4856_s8 + $0xd4] ss:$8 sps:$4 sm:$0xff]   ;;  %v2956_v59 = vld [vmem:[%s4856_s8 + $0xd0] ss:$8 sps:$4 sm:$0xff]   ;;  %v2957_v46 = vld [vmem:[%s4856_s8 + $0xe4] ss:$8 sps:$4 sm:$0xff]  }
 0x325   : > { %v4292_v26 = vsub.f32 %v4107_v50, %v1306_v34  ;;  %v4295_v48 = vsub.f32 %v4111_v63, %v1306_v34  ;;  %v1357_v33 = vmul.f32 %v4282_v14, %v4282_v14  ;;  %v1358_v16 = vmul.f32 %v4285_v11, %v4285_v11  ;;  %v2936_v63 = vld [vmem:[%s4856_s8 + $0x74] ss:$8 sps:$4 sm:$0xff]   ;;  %2052 = vmatpush1.bf16.msra.mxu0 %v2935_v58  ;;  %v2959_v9 = vld [vmem:[%s4856_s8 + $0xe0] ss:$8 sps:$4 sm:$0xff]   ;;  %v2962_v44 = vld [vmem:[%s4856_s8 + $0xf0] ss:$8 sps:$4 sm:$0xff]  }
 0x326   : > { %1388 = vadd.xlane.f32.xlu0 %v1387_v39  ;;  %v1390_v35 = vadd.f32 %v1356_v40, %v1355_v62  ;;  %2704 = vmatprep.subr.bf16.mxu1 %v2936_v63  ;;  %v2960_v23 = vld [vmem:[%s4856_s8 + $0xf4] ss:$8 sps:$4 sm:$0xff]   ;;  %v2965_v58 = vld [vmem:[%s4858_s10 + $0x4] ss:$8 sps:$4 sm:$0xff]  }
 0x327   : > { %v1393_v36 = vadd.f32 %v1358_v16, %v1357_v33  ;;  %v1359_v31 = vmul.f32 %v4292_v26, %v4292_v26  ;;  %v1360_v50 = vmul.f32 %v4295_v48, %v4295_v48  ;;  %2053 = vmatprep.subr.bf16.mxu0 %v2936_v63 }
 0x328   : > { %1391 = vadd.xlane.f32.xlu1 %v1390_v35  ;;  %2720 = vmatpush1.bf16.msra.mxu1 %v2938_v57 }
 0x329   : > { %v1396_v7 = vadd.f32 %v1360_v50, %v1359_v31  ;;  %2705 = vmatprep.subr.bf16.mxu1 %v2939_v37  ;;  %2054 = vmatpush1.bf16.msra.mxu0 %v2938_v57 }
 0x32a   : > { %1394 = vadd.xlane.f32.xlu0 %v1393_v36  ;;  %2055 = vmatprep.subr.bf16.mxu0 %v2939_v37 }
 0x32c   : > { %1397 = vadd.xlane.f32.xlu1 %v1396_v7  ;;  %2721 = vmatpush1.bf16.msra.mxu1 %v2941_v22 }
 0x32d   : > { %2056 = vmatpush1.bf16.msra.mxu0 %v2941_v22  ;;  %2706 = vmatprep.subr.bf16.mxu1 %v2942_v47 }
 0x32e   : > { %2057 = vmatprep.subr.bf16.mxu0 %v2942_v47 }
 0x330   : > { %2722 = vmatpush1.bf16.msra.mxu1 %v2944_v4 }
 0x331   : > { %2058 = vmatpush1.bf16.msra.mxu0 %v2944_v4  ;;  %2707 = vmatprep.subr.bf16.mxu1 %v2945_v17 }
 0x332   : > { %2059 = vmatprep.subr.bf16.mxu0 %v2945_v17 }
 0x334   : > { %2723 = vmatpush1.bf16.msra.mxu1 %v2947_v56 }
 0x335   : > { %2060 = vmatpush1.bf16.msra.mxu0 %v2947_v56  ;;  %2708 = vmatprep.subr.bf16.mxu1 %v2948_v27 }
 0x336   : > { %2061 = vmatprep.subr.bf16.mxu0 %v2948_v27 }
 0x338   : > { %2724 = vmatpush1.bf16.msra.mxu1 %v2950_v18 }
 0x339   : > { %2062 = vmatpush1.bf16.msra.mxu0 %v2950_v18  ;;  %2709 = vmatprep.subr.bf16.mxu1 %v2951_v21 }
 0x33a   : > { %2063 = vmatprep.subr.bf16.mxu0 %v2951_v21 }
 0x33c   : > { %2725 = vmatpush1.bf16.msra.mxu1 %v2953_v3 }
 0x33d   : > { %2064 = vmatpush1.bf16.msra.mxu0 %v2953_v3  ;;  %2710 = vmatprep.subr.bf16.mxu1 %v2954_v60 }
 0x33e   : > { %2065 = vmatprep.subr.bf16.mxu0 %v2954_v60  ;;  %v1251_v60 = vld [vmem:[%s4855_s7] sm:$0x3] }
 0x340   : > { %2726 = vmatpush1.bf16.msra.mxu1 %v2956_v59 }
 0x341   : > { %2066 = vmatpush1.bf16.msra.mxu0 %v2956_v59  ;;  %2711 = vmatprep.subr.bf16.mxu1 %v2957_v46 }
 0x342   : > { %2067 = vmatprep.subr.bf16.mxu0 %v2957_v46 }
 0x344   : > { %2727 = vmatpush1.bf16.msra.mxu1 %v2959_v9 }
 0x345   : > { %2712 = vmatprep.subr.bf16.mxu1 %v2960_v23  ;;  %2068 = vmatpush1.bf16.msra.mxu0 %v2959_v9 }
 0x346   : > { %2069 = vmatprep.subr.bf16.mxu0 %v2960_v23 }
 0x348   : > { %2728 = vmatpush1.bf16.msra.mxu1 %v2962_v44 }
 0x349   : > { %2070 = vmatpush1.bf16.msra.mxu0 %v2962_v44  ;;  %2268 = vmatprep.subr.bf16.mxu1 %v2965_v58  ;;  %v4396_v58 = vrot.slane %v1251_v60, %v3968_v6 }
 0x392   : > { %v1407_v34 = vpop.xlane.xlu0 %1406 }
 0x393   : > { %v1437_v62 = vmul.f32 0.00390625, %v1407_v34  ;;  %v4399_v34 = vrot.slane %v1251_v60, %v3975_v19 }
 0x394   : > { %v1410_v39 = vpop.xlane.xlu1 %1409 }
 0x395   : > { %v1453_v40 = vadd.f32 1e-05, %v1437_v62  ;;  %v1438_v33 = vmul.f32 0.00390625, %v1410_v39 }
 0x396   : > { %v1272_v16 = vpop.xlane.xlu0 %1271 }
 0x397   : > { %3147 = vrsqrt.f32 %v1453_v40  ;;  %v1454_v35 = vadd.f32 1e-05, %v1438_v33  ;;  %v1307_v36 = vmul.f32 0.00390625, %v1272_v16 }
 0x398   : > { %v1275_v31 = vpop.xlane.xlu1 %1274 }
 0x399   : > { %3149 = vrsqrt.f32 %v1454_v35  ;;  %v4363_v50 = vsub.f32 %v3984_v28, %v1307_v36  ;;  %v4366_v63 = vsub.f32 %v3987_v1, %v1307_v36  ;;  %v1308_v57 = vmul.f32 0.00390625, %v1275_v31 }
 0x39a   : > { %v1413_v7 = vpop.xlane.xlu0 %1412 }
 0x39b   : > { %v4369_v37 = vsub.f32 %v3990_v45, %v1308_v57  ;;  %v4372_v22 = vsub.f32 %v3993_v54, %v1308_v57  ;;  %v1439_v47 = vmul.f32 0.00390625, %v1413_v7  ;;  %v1361_v4 = vmul.f32 %v4363_v50, %v4363_v50  ;;  %v1250_v54 = vld [vmem:[%s4854_s6] sm:$0x3] }
 0x39c   : > { %v1416_v17 = vpop.xlane.xlu1 %1415  ;;  %v1362_v28 = vmul.f32 %v4366_v63, %v4366_v63  ;;  %v4389_v59 = vrot.slane %v1250_v54, %v3968_v6  ;;  %v4392_v46 = vrot.slane %v1250_v54, %v3975_v19 }
 0x39d   : > { %v1455_v56 = vadd.f32 1e-05, %v1439_v47  ;;  %v1440_v27 = vmul.f32 0.00390625, %v1416_v17  ;;  %v1363_v1 = vmul.f32 %v4369_v37, %v4369_v37  ;;  %v1364_v45 = vmul.f32 %v4372_v22, %v4372_v22 }
 0x39e   : > { %v1399_v18 = vadd.f32 %v1362_v28, %v1361_v4 }
 0x39f   : > { %3151 = vrsqrt.f32 %v1455_v56  ;;  %v1456_v21 = vadd.f32 1e-05, %v1440_v27  ;;  %v1402_v3 = vadd.f32 %v1364_v45, %v1363_v1 }
 0x3a0   : > { %1400 = vadd.xlane.f32.xlu0 %v1399_v18 }
 0x3a1   : > { %v3148_v9 = vpop.eup %3147  ;;  %3153 = vrsqrt.f32 %v1456_v21  ;;  %1403 = vadd.xlane.f32.xlu1 %v1402_v3 }
 0x3a2   : > { %v1419_v23 = vpop.xlane.xlu0 %1418  ;;  %v1494_v44 = vmul.f32 %v3148_v9, %v4141_v32  ;;  %v1493_v62 = vmul.f32 %v3148_v9, %v4138_v13 }
 0x3a3   : > { %v3150_v39 = vpop.eup %3149  ;;  %v1441_v40 = vmul.f32 0.00390625, %v1419_v23 }
 0x3a4   : > { %v1422_v33 = vpop.xlane.xlu1 %1421  ;;  %v1496_v16 = vmul.f32 %v3150_v39, %v4147_v52  ;;  %v1537_v35 = vmul.f32 %v4392_v46, %v1494_v44  ;;  %v1495_v36 = vmul.f32 %v3150_v39, %v4144_v41  ;;  %v1536_v31 = vmul.f32 %v4389_v59, %v1493_v62 }
 0x3a5   : > { %v1457_v32 = vadd.f32 1e-05, %v1441_v40  ;;  %v1442_v57 = vmul.f32 0.00390625, %v1422_v33 }
 0x3a6   : > { %v1539_v7 = vmul.f32 %v4392_v46, %v1496_v16  ;;  %v4408_v47 = vadd.f32 %v4399_v34, %v1537_v35  ;;  %v1538_v13 = vmul.f32 %v4389_v59, %v1495_v36  ;;  %v4412_v4 = vadd.f32 %v4396_v58, %v1536_v31 }
 0x3a7   : > { %3155 = vrsqrt.f32 %v1457_v32  ;;  %v1458_v52 = vadd.f32 1e-05, %v1442_v57 }
 0x3a8   : > { %v4415_v17 = vadd.f32 %v4399_v34, %v1539_v7  ;;  %v2626_v41 = vmul.f32 -1.442695, %v4408_v47  ;;  %v4419_v28 = vadd.f32 %v4396_v58, %v1538_v13  ;;  %v2625_v56 = vmul.f32 -1.442695, %v4412_v4 }
 0x3a9   : > { %v3152_v27 = vpop.eup %3151  ;;  %3157 = vrsqrt.f32 %v1458_v52 }
 0x3aa   : > { %3159 = vpow2.f32 %v2626_v41  ;;  %v2628_v1 = vmul.f32 -1.442695, %v4415_v17  ;;  %v2627_v45 = vmul.f32 -1.442695, %v4419_v28  ;;  %v1498_v54 = vmul.f32 %v3152_v27, %v4161_v55 }
 0x3ab   : > { %v3154_v18 = vpop.eup %3153  ;;  %v1425_v21 = vpop.xlane.xlu0 %1424  ;;  %3161 = vpow2.f32 %v2625_v56  ;;  %v1497_v3 = vmul.f32 %v3152_v27, %v4158_v24 }
 0x3ac   : > { %v1443_v60 = vmul.f32 0.00390625, %v1425_v21  ;;  %3163 = vpow2.f32 %v2628_v1  ;;  %v1500_v9 = vmul.f32 %v3154_v18, %v4171_v8  ;;  %v1541_v23 = vmul.f32 %v4392_v46, %v1498_v54 }
 0x3ad   : > { %v1428_v44 = vpop.xlane.xlu1 %1427  ;;  %3165 = vpow2.f32 %v2627_v45  ;;  %v1499_v62 = vmul.f32 %v3154_v18, %v4168_v49  ;;  %v1540_v39 = vmul.f32 %v4389_v59, %v1497_v3 }
 0x3ae   : > { %v1459_v40 = vadd.f32 1e-05, %v1443_v60  ;;  %v1444_v33 = vmul.f32 0.00390625, %v1428_v44  ;;  %v1543_v55 = vmul.f32 %v4392_v46, %v1500_v9  ;;  %v4432_v16 = vadd.f32 %v4399_v34, %v1541_v23 }
 0x3af   : > { %v1383_v24 = vpop.xlane.xlu0 %1382  ;;  %v1542_v35 = vmul.f32 %v4389_v59, %v1499_v62  ;;  %v4440_v7 = vadd.f32 %v4396_v58, %v1540_v39 }
 0x3b0   : > { %3167 = vrsqrt.f32 %v1459_v40  ;;  %v1460_v8 = vadd.f32 1e-05, %v1444_v33  ;;  %v1429_v36 = vmul.f32 0.00390625, %v1383_v24  ;;  %v4436_v31 = vadd.f32 %v4399_v34, %v1543_v55 }
 0x3b1   : > { %v3156_v32 = vpop.eup %3155  ;;  %v1386_v49 = vpop.xlane.xlu1 %1385  ;;  %v2630_v57 = vmul.f32 -1.442695, %v4432_v16  ;;  %v4444_v1 = vadd.f32 %v4396_v58, %v1542_v35 }
 0x3b2   : > { %3169 = vrsqrt.f32 %v1460_v8  ;;  %v1445_v13 = vadd.f32 1e-05, %v1429_v36  ;;  %v1430_v52 = vmul.f32 0.00390625, %v1386_v49  ;;  %v2632_v41 = vmul.f32 -1.442695, %v4436_v31 }
 0x3b3   : > { %v3158_v56 = vpop.eup %3157  ;;  %v1389_v27 = vpop.xlane.xlu0 %1388  ;;  %3171 = vpow2.f32 %v2630_v57  ;;  %v1502_v45 = vmul.f32 %v3156_v32, %v4185_v12  ;;  %v1501_v54 = vmul.f32 %v3156_v32, %v4182_v38  ;;  %v2629_v49 = vmul.f32 -1.442695, %v4440_v7 }
 0x3b4   : > { %v3160_v18 = vpop.eup %3159  ;;  %3173 = vrsqrt.f32 %v1445_v13  ;;  %v1446_v21 = vadd.f32 1e-05, %v1430_v52  ;;  %v1431_v3 = vmul.f32 0.00390625, %v1389_v27  ;;  %v1504_v60 = vmul.f32 %v3158_v56, %v4191_v10 }
 0x3b5   : > { %v3162_v9 = vpop.eup %3161  ;;  %v1392_v23 = vpop.xlane.xlu1 %1391  ;;  %v1708_v44 = vadd.f32 1.0, %v3160_v18  ;;  %3175 = vpow2.f32 %v2632_v41  ;;  %v1545_v62 = vmul.f32 %v4392_v46, %v1502_v45  ;;  %v1503_v39 = vmul.f32 %v3158_v56, %v4188_v43 }
 0x3b6   : > { %v3164_v40 = vpop.eup %3163  ;;  %3177 = vrsqrt.f32 %v1446_v21  ;;  %v1447_v33 = vadd.f32 1e-05, %v1431_v3  ;;  %v1432_v12 = vmul.f32 0.00390625, %v1392_v23  ;;  %v1707_v55 = vadd.f32 1.0, %v3162_v9 }
 0x3b7   : > { %v3166_v38 = vpop.eup %3165  ;;  %v1395_v24 = vpop.xlane.xlu0 %1394  ;;  %v1710_v35 = vadd.f32 1.0, %v3164_v40  ;;  %3179 = vrcp.f32 %v1708_v44  ;;  %v1547_v8 = vmul.f32 %v4392_v46, %v1504_v60  ;;  %v4453_v10 = vadd.f32 %v4399_v34, %v1545_v62 }
 0x3b8   : > { %3181 = vrsqrt.f32 %v1447_v33  ;;  %v1448_v36 = vadd.f32 1e-05, %v1432_v12  ;;  %v1433_v32 = vmul.f32 0.00390625, %v1395_v24  ;;  %v1709_v57 = vadd.f32 1.0, %v3166_v38 }
 0x3b9   : > { %v1398_v43 = vpop.xlane.xlu1 %1397  ;;  %3183 = vrcp.f32 %v1710_v35  ;;  %v4457_v13 = vadd.f32 %v4399_v34, %v1547_v8  ;;  %v1544_v52 = vmul.f32 %v4389_v59, %v1501_v54  ;;  %v1546_v45 = vmul.f32 %v4389_v59, %v1503_v39 }
 0x3ba   : > { %v3168_v41 = vpop.eup %3167  ;;  %3185 = vrsqrt.f32 %v1448_v36  ;;  %v1449_v56 = vadd.f32 1e-05, %v1433_v32  ;;  %v1434_v27 = vmul.f32 0.00390625, %v1398_v43  ;;  %v2631_v18 = vmul.f32 -1.442695, %v4444_v1 }
 0x3bb   : > { %3187 = vrcp.f32 %v1707_v55  ;;  %v2634_v21 = vmul.f32 -1.442695, %v4453_v10  ;;  %v1506_v3 = vmul.f32 %v3168_v41, %v4205_v42  ;;  %v2636_v23 = vmul.f32 -1.442695, %v4457_v13 }
 0x3bc   : > { %v3170_v60 = vpop.eup %3169  ;;  %3189 = vrsqrt.f32 %v1449_v56  ;;  %v1450_v9 = vadd.f32 1e-05, %v1434_v27  ;;  %v1505_v54 = vmul.f32 %v3168_v41, %v4202_v61  ;;  %v4467_v62 = vadd.f32 %v4396_v58, %v1544_v52 }
 0x3bd   : > { %v3172_v44 = vpop.eup %3171  ;;  %3191 = vrcp.f32 %v1709_v57  ;;  %v1508_v39 = vmul.f32 %v3170_v60, %v4217_v25  ;;  %v1549_v40 = vmul.f32 %v4392_v46, %v1506_v3  ;;  %v4472_v42 = vadd.f32 %v4396_v58, %v1546_v45 }
 0x3be   : > { %v3174_v33 = vpop.eup %3173  ;;  %3193 = vrsqrt.f32 %v1450_v9  ;;  %v1712_v12 = vadd.f32 1.0, %v3172_v44  ;;  %v1507_v55 = vmul.f32 %v3170_v60, %v4214_v0  ;;  %v1548_v36 = vmul.f32 %v4389_v59, %v1505_v54 }
 0x3bf   : > { %v3176_v38 = vpop.eup %3175  ;;  %v1477_v61 = vmul.f32 %v3174_v33, %v4224_v20  ;;  %3195 = vpow2.f32 %v2629_v49  ;;  %v1551_v24 = vmul.f32 %v4392_v46, %v1508_v39  ;;  %v4478_v35 = vadd.f32 %v4399_v34, %v1549_v40 }
 0x3c0   : > { %v3178_v25 = vpop.eup %3177  ;;  %v1714_v8 = vadd.f32 1.0, %v3176_v38  ;;  %3197 = vrcp.f32 %v1712_v12  ;;  %v1550_v32 = vmul.f32 %v4389_v59, %v1507_v55  ;;  %v2633_v0 = vmul.f32 -1.442695, %v4467_v62 }
 0x3c1   : > { %v3180_v43 = vpop.eup %3179  ;;  %v1520_v57 = vmul.f32 %v4389_v59, %v1477_v61  ;;  %3199 = vpow2.f32 %v2631_v18  ;;  %v4485_v20 = vadd.f32 %v4399_v34, %v1551_v24  ;;  %v1479_v52 = vmul.f32 %v3178_v25, %v4240_v29 }
 0x3c2   : > { %v4487_v49 = vpop.eup %3181  ;;  %3201 = vrcp.f32 %v1714_v8  ;;  %v2635_v41 = vmul.f32 -1.442695, %v4472_v42  ;;  %v4492_v56 = vadd.f32 %v4396_v58, %v1548_v36  ;;  %v1804_v45 = vmul.f32 %v3180_v43, %v4408_v47  ;;  %v2963_v36 = vld [vmem:[%s4858_s10] ss:$8 sps:$4 sm:$0xff]  }
 0x3c3   : > { %v3184_v27 = vpop.eup %3183  ;;  %3203 = vpow2.f32 %v2634_v21  ;;  %v2638_v18 = vmul.f32 -1.442695, %v4478_v35  ;;  %v4497_v3 = vadd.f32 %v4396_v58, %v1550_v32  ;;  %v2640_v29 = vmul.f32 -1.442695, %v4485_v20 }
 0x3c4   : > { %v4499_v60 = vpop.eup %3185  ;;  %v1806_v9 = vmul.f32 %v3184_v27, %v4415_v17  ;;  %3205 = vpow2.f32 %v2636_v23  ;;  %v1478_v54 = vmul.f32 %v3174_v33, %v4227_v30  ;;  %v2637_v39 = vmul.f32 -1.442695, %v4492_v56 }
 0x3c5   : > { %v3188_v44 = vpop.eup %3187  ;;  %3207 = vpow2.f32 %v2633_v0  ;;  %v1480_v47 = vmul.f32 %v3178_v25, %v4243_v15  ;;  %v4507_v21 = vadd.f32 %v4396_v58, %v1520_v57  ;;  %v2639_v17 = vmul.f32 -1.442695, %v4497_v3 }
 0x3c6   : > { %v4509_v40 = vpop.eup %3189  ;;  %v1860_v12 = vpack.c.bf16 %v1806_v9, %v1804_v45  ;;  %3209 = vpow2.f32 %v2635_v41  ;;  %v1521_v23 = vmul.f32 %v4392_v46, %v1478_v54  ;;  %v1803_v30 = vmul.f32 %v3188_v44, %v4412_v4 }
 0x3c7   : > { %v3192_v55 = vpop.eup %3191  ;;  %3211 = vpow2.f32 %v2638_v18  ;;  %v1523_v33 = vmul.f32 %v4392_v46, %v1480_v47  ;;  %v2609_v38 = vmul.f32 -1.442695, %v4507_v21  ;;  %v1482_v25 = vmul.f32 %v4487_v49, %v4253_v51  ;;  %v2968_v51 = vld [vmem:[%s4858_s10 + $0x14] ss:$8 sps:$4 sm:$0xff]  }
 0x3c8   : > { %v4516_v15 = vpop.eup %3193  ;;  %2111 = vmatprep.mubr.bf16.mxu1 %v1860_v12  ;;  %v1805_v61 = vmul.f32 %v3192_v55, %v4419_v28  ;;  %3213 = vpow2.f32 %v2640_v29  ;;  %v4520_v24 = vadd.f32 %v4399_v34, %v1521_v23  ;;  %v1522_v4 = vmul.f32 %v4389_v59, %v1479_v52  ;;  %v2966_v29 = vld [vmem:[%s4858_s10 + $0x10] ss:$8 sps:$4 sm:$0xff]   ;;  %v2971_v12 = vld [vmem:[%s4858_s10 + $0x24] ss:$8 sps:$4 sm:$0xff]  }
 0x3c9   : > { %v3196_v8 = vpop.eup %3195  ;;  %3215 = vpow2.f32 %v2637_v39  ;;  %v4529_v32 = vadd.f32 %v4399_v34, %v1523_v33  ;;  %v1484_v28 = vmul.f32 %v4499_v60, %v4269_v53  ;;  %v1525_v53 = vmul.f32 %v4392_v46, %v1482_v25 }
 0x3ca   : > { %v3198_v43 = vpop.eup %3197  ;;  %v1859_v57 = vpack.c.bf16 %v1805_v61, %v1803_v30  ;;  %v1711_v0 = vadd.f32 1.0, %v3196_v8  ;;  %3217 = vpow2.f32 %v2639_v17  ;;  %v2610_v52 = vmul.f32 -1.442695, %v4520_v24 }
 0x3cb   : > { %v3200_v41 = vpop.eup %3199  ;;  %v2612_v27 = vmul.f32 -1.442695, %v4529_v32  ;;  %3219 = vpow2.f32 %v2609_v38  ;;  %v1808_v54 = vmul.f32 %v3198_v43, %v4432_v16  ;;  %v4545_v39 = vadd.f32 %v4396_v58, %v1522_v4 }
 0x3cc   : > { %v3202_v45 = vpop.eup %3201  ;;  %2112 = vmatmul.mubr.bf16.vlgmr.msra.gmra.mrb[0].mxu1 %v1859_v57  ;;  %v1713_v18 = vadd.f32 1.0, %v3200_v41  ;;  %3221 = vrcp.f32 %v1711_v0  ;;  %v1527_v23 = vmul.f32 %v4392_v46, %v1484_v28  ;;  %v1481_v55 = vmul.f32 %v4487_v49, %v4250_v5  ;;  %v2969_v5 = vld [vmem:[%s4858_s10 + $0x20] ss:$8 sps:$4 sm:$0xff]  }
 0x3cd   : > { %v3204_v9 = vpop.eup %3203  ;;  %2269 = vmatpush1.bf16.msra.mxu1 %v2963_v36  ;;  %v1810_v44 = vmul.f32 %v3202_v45, %v4436_v31  ;;  %3223 = vpow2.f32 %v2610_v52  ;;  %v1483_v33 = vmul.f32 %v4499_v60, %v4266_v2  ;;  %v4556_v25 = vadd.f32 %v4399_v34, %v1525_v53  ;;  %v2974_v36 = vld [vmem:[%s4858_s10 + $0x34] ss:$8 sps:$4 sm:$0xff]  }
 0x3ce   : > { %v3206_v47 = vpop.eup %3205  ;;  %2270 = vmatprep.subr.bf16.mxu1 %v2968_v51  ;;  %3225 = vrcp.f32 %v1713_v18  ;;  %v1716_v17 = vadd.f32 1.0, %v3204_v9  ;;  %v2611_v4 = vmul.f32 -1.442695, %v4545_v39  ;;  %v1486_v2 = vmul.f32 %v4509_v40, %v4285_v11 }
 0x3cf   : > { %v3208_v16 = vpop.eup %3207  ;;  %v1862_v30 = vpack.c.bf16 %v1810_v44, %v1808_v54  ;;  %v1718_v31 = vadd.f32 1.0, %v3206_v47  ;;  %3227 = vpow2.f32 %v2612_v27  ;;  %v1524_v43 = vmul.f32 %v4389_v59, %v1481_v55  ;;  %v2977_v47 = vld [vmem:[%s4858_s10 + $0x44] ss:$8 sps:$4 sm:$0xff]  }
 0x3d0   : > { %v3210_v38 = vpop.eup %3209  ;;  %3229 = vrcp.f32 %v1716_v17  ;;  %v1715_v61 = vadd.f32 1.0, %v3208_v16  ;;  %v1488_v57 = vmul.f32 %v4516_v15, %v4295_v48  ;;  %v4571_v52 = vadd.f32 %v4399_v34, %v1527_v23  ;;  %v2972_v48 = vld [vmem:[%s4858_s10 + $0x30] ss:$8 sps:$4 sm:$0xff]  }
 0x3d1   : > { %v3212_v8 = vpop.eup %3211  ;;  %2271 = vmatpush1.bf16.msra.mxu1 %v2966_v29  ;;  %2121 = vmatprep.mubr.bf16.mxu1 %v1862_v30  ;;  %3231 = vrcp.f32 %v1718_v31  ;;  %v1717_v49 = vadd.f32 1.0, %v3210_v38  ;;  %v1526_v11 = vmul.f32 %v4389_v59, %v1483_v33  ;;  %v2614_v45 = vmul.f32 -1.442695, %v4556_v25 }
 0x3d2   : > { %v3214_v60 = vpop.eup %3213  ;;  %2272 = vmatprep.subr.bf16.mxu1 %v2971_v12  ;;  %3233 = vrcp.f32 %v1715_v61  ;;  %v1720_v28 = vadd.f32 1.0, %v3212_v8  ;;  %v1529_v18 = vmul.f32 %v4392_v46, %v1486_v2  ;;  %v1531_v29 = vmul.f32 %v4392_v46, %v1488_v57 }
 0x3d3   : > { %v3216_v51 = vpop.eup %3215  ;;  %3235 = vrcp.f32 %v1717_v49  ;;  %v1722_v0 = vadd.f32 1.0, %v3214_v60  ;;  %v1485_v54 = vmul.f32 %v4509_v40, %v4282_v14  ;;  %v4586_v17 = vadd.f32 %v4396_v58, %v1524_v43  ;;  %v2975_v49 = vld [vmem:[%s4858_s10 + $0x40] ss:$8 sps:$4 sm:$0xff]  }
 0x3d4   : > { %v3218_v41 = vpop.eup %3217  ;;  %3237 = vrcp.f32 %v1720_v28  ;;  %v1719_v27 = vadd.f32 1.0, %v3216_v51  ;;  %v1487_v23 = vmul.f32 %v4516_v15, %v4292_v26  ;;  %v2616_v16 = vmul.f32 -1.442695, %v4571_v52 }
 0x3d5   : > { %v3220_v53 = vpop.eup %3219  ;;  %2273 = vmatpush1.bf16.msra.mxu1 %v2969_v5  ;;  %3239 = vrcp.f32 %v1722_v0  ;;  %v1721_v9 = vadd.f32 1.0, %v3218_v41  ;;  %v4592_v14 = vadd.f32 %v4396_v58, %v1526_v11  ;;  %v1528_v40 = vmul.f32 %v4389_v59, %v1485_v54 }
 0x3d6   : > { %v3222_v44 = vpop.eup %3221  ;;  %2274 = vmatprep.subr.bf16.mxu1 %v2974_v36  ;;  %3241 = vrcp.f32 %v1719_v27  ;;  %v1691_v12 = vadd.f32 1.0, %v3220_v53  ;;  %v4596_v33 = vadd.f32 %v4399_v34, %v1529_v18  ;;  %v1530_v38 = vmul.f32 %v4389_v59, %v1487_v23  ;;  %v2980_v36 = vld [vmem:[%s4858_s10 + $0x54] ss:$8 sps:$4 sm:$0xff]  }
 0x3d7   : > { %v3224_v55 = vpop.eup %3223  ;;  %3243 = vrcp.f32 %v1721_v9  ;;  %v1807_v26 = vmul.f32 %v3222_v44, %v4440_v7  ;;  %v4602_v8 = vadd.f32 %v4399_v34, %v1531_v29  ;;  %v2613_v2 = vmul.f32 -1.442695, %v4586_v17  ;;  %v2983_v29 = vld [vmem:[%s4858_s10 + $0x64] ss:$8 sps:$4 sm:$0xff]  }
 0x3d8   : > { %v3226_v30 = vpop.eup %3225  ;;  %v1692_v31 = vadd.f32 1.0, %v3224_v55  ;;  %3245 = vpow2.f32 %v2611_v4  ;;  %v4609_v60 = vadd.f32 %v4396_v58, %v1528_v40  ;;  %v2615_v28 = vmul.f32 -1.442695, %v4592_v14 }
 0x3d9   : > { %v3228_v61 = vpop.eup %3227  ;;  %v1809_v15 = vmul.f32 %v3226_v30, %v4444_v1  ;;  %2275 = vmatpush1.bf16.msra.mxu1 %v2972_v48  ;;  %3247 = vrcp.f32 %v1691_v12  ;;  %v4616_v43 = vadd.f32 %v4396_v58, %v1530_v38  ;;  %v2618_v11 = vmul.f32 -1.442695, %v4596_v33  ;;  %v2978_v48 = vld [vmem:[%s4858_s10 + $0x50] ss:$8 sps:$4 sm:$0xff]  }
 0x3da   : > { %v3230_v5 = vpop.eup %3229  ;;  %2276 = vmatprep.subr.bf16.mxu1 %v2977_v47  ;;  %v1694_v4 = vadd.f32 1.0, %v3228_v61  ;;  %3249 = vrcp.f32 %v1692_v31  ;;  %v2620_v27 = vmul.f32 -1.442695, %v4602_v8 }
 0x3db   : > { %v3232_v7 = vpop.eup %3231  ;;  %v1861_v1 = vpack.c.bf16 %v1809_v15, %v1807_v26  ;;  %3251 = vpow2.f32 %v2614_v45  ;;  %v1812_v51 = vmul.f32 %v3230_v5, %v4453_v10  ;;  %v2617_v10 = vmul.f32 -1.442695, %v4609_v60  ;;  %v2984_v26 = vld [vmem:[%s4858_s10 + $0x70] ss:$8 sps:$4 sm:$0xff]  }
 0x3dc   : > { %v3234_v57 = vpop.eup %3233  ;;  %v1814_v0 = vmul.f32 %v3232_v7, %v4457_v13  ;;  %3253 = vrcp.f32 %v1694_v4  ;;  %v2619_v54 = vmul.f32 -1.442695, %v4616_v43 }
 0x3dd   : > { %v3236_v41 = vpop.eup %3235  ;;  %2122 = vmatmul.mubr.bf16.gmra.mrb[4].mxu1 %v1861_v1  ;;  %3255 = vpow2.f32 %v2616_v16  ;;  %v1811_v9 = vmul.f32 %v3234_v57, %v4467_v62  ;;  %v2981_v16 = vld [vmem:[%s4858_s10 + $0x60] ss:$8 sps:$4 sm:$0xff]  }
 0x3de   : > { %v3238_v18 = vpop.eup %3237  ;;  %v1864_v45 = vpack.c.bf16 %v1814_v0, %v1812_v51  ;;  %v1813_v53 = vmul.f32 %v3236_v41, %v4472_v42  ;;  %2277 = vmatpush1.bf16.msra.mxu1 %v2975_v49  ;;  %3257 = vpow2.f32 %v2613_v2 }
 0x3df   : > { %v3240_v13 = vpop.eup %3239  ;;  %2278 = vmatprep.subr.bf16.mxu1 %v2980_v36  ;;  %3259 = vpow2.f32 %v2615_v28  ;;  %v1816_v44 = vmul.f32 %v3238_v18, %v4478_v35  ;;  %v2986_v35 = vld [vmem:[%s4858_s10 + $0x74] ss:$8 sps:$4 sm:$0xff]  }
 0x3e0   : > { %v3242_v42 = vpop.eup %3241  ;;  %2131 = vmatprep.mubr.bf16.mxu1 %v1864_v45  ;;  %v1818_v47 = vmul.f32 %v3240_v13, %v4485_v20  ;;  %3261 = vpow2.f32 %v2618_v11  ;;  %v1863_v23 = vpack.c.bf16 %v1813_v53, %v1811_v9  ;;  %v3307_v13 = vld [vmem:[%s3513_s19] sm:$0xff]  ;;  %v3308_v9 = vld [vmem:[%s3513_s19 + $0x8] sm:$0xff] }
 0x3e1   : > { %v3244_v12 = vpop.eup %3243  ;;  %3263 = vpow2.f32 %v2620_v27  ;;  %v1815_v49 = vmul.f32 %v3242_v42, %v4492_v56  ;;  %v3387_v27 = vmov 0  }
 0x3e2   : > { %v3246_v55 = vpop.eup %3245  ;;  %2279 = vmatpush1.bf16.msra.mxu1 %v2978_v48  ;;  %v1866_v62 = vpack.c.bf16 %v1818_v47, %v1816_v44  ;;  %3265 = vpow2.f32 %v2617_v10  ;;  %v1817_v38 = vmul.f32 %v3244_v12, %v4497_v3 }
 0x3e3   : > { %v3248_v40 = vpop.eup %3247  ;;  %2280 = vmatprep.subr.bf16.mxu1 %v2983_v29  ;;  %v1693_v30 = vadd.f32 1.0, %v3246_v55  ;;  %3267 = vpow2.f32 %v2619_v54  ;;  %v2168_v29 = vpack.c.bf16 %v3308_v9, %v3307_v13 }
 0x3e4   : > { %v3250_v20 = vpop.eup %3249  ;;  %v1865_v36 = vpack.c.bf16 %v1817_v38, %v1815_v49  ;;  %v1787_v48 = vmul.f32 %v3248_v40, %v4507_v21  ;;  %v3313_v49 = vld [vmem:[%s3513_s19 + $0x30] sm:$0xff] }
 0x3e5   : > { %v3252_v31 = vpop.eup %3251  ;;  %2132 = vmatmul.mubr.bf16.gmra.mrb[8].mxu1 %v1863_v23  ;;  %3269 = vrcp.f32 %v1693_v30  ;;  %v1788_v4 = vmul.f32 %v3250_v20, %v4520_v24 }
 0x3e6   : > { %v3254_v61 = vpop.eup %3253  ;;  %2141 = vmatprep.mubr.bf16.mxu1 %v1866_v62  ;;  %2281 = vmatpush1.bf16.msra.mxu1 %v2981_v16  ;;  %v1696_v15 = vadd.f32 1.0, %v3252_v31 }
 0x3e7   : > { %v3256_v5 = vpop.eup %3255  ;;  %v1790_v2 = vmul.f32 %v3254_v61, %v4529_v32  ;;  %2282 = vmatprep.subr.bf16.mxu1 %v2986_v35  ;;  %v3309_v35 = vld [vmem:[%s3513_s19 + $0x10] sm:$0xff] }
 0x3e8   : > { %v3258_v7 = vpop.eup %3257  ;;  %v1698_v1 = vadd.f32 1.0, %v3256_v5  ;;  %3271 = vrcp.f32 %v1696_v15 }
 0x3e9   : > { %v3260_v3 = vpop.eup %3259  ;;  %v1852_v28 = vpack.c.bf16 %v1790_v2, %v1788_v4  ;;  %v1695_v57 = vadd.f32 1.0, %v3258_v7  ;;  %v3314_v4 = vld [vmem:[%s3513_s19 + $0x38] sm:$0xff]  ;;  %v3316_v2 = vld [vmem:[%s3513_s19 + $0x48] sm:$0xff] }
 0x3ea   : > { %v3262_v51 = vpop.eup %3261  ;;  %2283 = vmatpush1.bf16.msra.mxu1 %v2984_v26  ;;  %3273 = vrcp.f32 %v1698_v1  ;;  %v1697_v0 = vadd.f32 1.0, %v3260_v3  ;;  %v3312_v26 = vld [vmem:[%s3513_s19 + $0x28] sm:$0xff]  ;;  %v3317_v1 = vld [vmem:[%s3513_s19 + $0x50] sm:$0xff]  ;;  %v3318_v3 = vld [vmem:[%s3513_s19 + $0x58] sm:$0xff] }
 0x3eb   : > { %v3264_v11 = vpop.eup %3263  ;;  %2071 = vmatprep.mubr.bf16.mxu0 %v1852_v28  ;;  %3275 = vrcp.f32 %v1695_v57  ;;  %v1700_v56 = vadd.f32 1.0, %v3262_v51  ;;  %v3319_v28 = vld [vmem:[%s3513_s19 + $0x60] sm:$0xff]  ;;  %v3320_v57 = vld [vmem:[%s3513_s19 + $0x68] sm:$0xff] }
 0x3ec   : > { %v3266_v24 = vpop.eup %3265  ;;  %3277 = vrcp.f32 %v1697_v0  ;;  %v1702_v32 = vadd.f32 1.0, %v3264_v11  ;;  %v2174_v51 = vpack.c.bf16 %v3320_v57, %v3319_v28  ;;  %v3321_v0 = vld [vmem:[%s3513_s19 + $0x70] sm:$0xff]  ;;  %v3322_v11 = vld [vmem:[%s3513_s19 + $0x78] sm:$0xff] }
 0x3ed   : > { %v3268_v41 = vpop.eup %3267  ;;  %2142 = vmatmul.mubr.bf16.gmra.mrb[12].mxu1 %v1865_v36  ;;  %3279 = vrcp.f32 %v1700_v56  ;;  %v1699_v53 = vadd.f32 1.0, %v3266_v24  ;;  %v2173_v36 = vpack.c.bf16 %v3318_v3, %v3317_v1  ;;  %v2175_v56 = vpack.c.bf16 %v3322_v11, %v3321_v0 }
 0x3ee   : > { %2300 = vmatprep.mubr.bf16.mxu1 %v3387_v27  ;;  %3281 = vrcp.f32 %v1702_v32  ;;  %v1701_v18 = vadd.f32 1.0, %v3268_v41 }
 0x3ef   : > { %v3270_v45 = vpop.eup %3269 }
 0x3f0   : > { %v1789_v10 = vmul.f32 %v3270_v45, %v4545_v39  ;;  %3283 = vrcp.f32 %v1701_v18 }
 0x3f1   : > { %3285 = vrcp.f32 %v1699_v53 }
 0x3f2   : > { %v3272_v54 = vpop.eup %3271  ;;  %v1851_v42 = vpack.c.bf16 %v1789_v10, %v1787_v48 }
 0x3f3   : > { %v1792_v12 = vmul.f32 %v3272_v54, %v4556_v25 }
 0x3f4   : > { %v3274_v44 = vpop.eup %3273  ;;  %2072 = vmatmul.mubr.bf16.vlgmr.msra.gmra.mrb[32].mxu0 %v1851_v42 }
 0x3f5   : > { %v3276_v47 = vpop.eup %3275  ;;  %v1794_v23 = vmul.f32 %v3274_v44, %v4571_v52  ;;  %2301 = vmatmul.mubr.bf16.vlgmr.msra.gmra.mrb[16].mxu1 %v2168_v29  ;;  %v3310_v52 = vld [vmem:[%s3513_s19 + $0x18] sm:$0xff] }
 0x3f6   : > { %v3278_v21 = vpop.eup %3277  ;;  %2310 = vmatprep.mubr.bf16.mxu1 %v3387_v27  ;;  %v1791_v40 = vmul.f32 %v3276_v47, %v4586_v17  ;;  %v2169_v20 = vpack.c.bf16 %v3310_v52, %v3309_v35 }
 0x3f7   : > { %v3280_v39 = vpop.eup %3279  ;;  %v1854_v55 = vpack.c.bf16 %v1794_v23, %v1792_v12  ;;  %v1793_v62 = vmul.f32 %v3278_v21, %v4592_v14 }
 0x3f8   : > { %v3282_v16 = vpop.eup %3281  ;;  %v1796_v30 = vmul.f32 %v3280_v39, %v4596_v33 }
 0x3f9   : > { %2081 = vmatprep.mubr.bf16.mxu0 %v1854_v55  ;;  %v1798_v25 = vmul.f32 %v3282_v16, %v4602_v8  ;;  %v1853_v31 = vpack.c.bf16 %v1793_v62, %v1791_v40  ;;  %v3311_v8 = vld [vmem:[%s3513_s19 + $0x20] sm:$0xff] }
 0x3fa   : > { %v3284_v38 = vpop.eup %3283  ;;  %v2170_v15 = vpack.c.bf16 %v3312_v26, %v3311_v8  ;;  %v2176_v8 = vld [vmem:[%s4859_s11] sm:$0x3] }
 0x3fb   : > { %v1856_v61 = vpack.c.bf16 %v1798_v25, %v1796_v30  ;;  %v3286_v14 = vpop.eup %3285  ;;  %v1797_v17 = vmul.f32 %v3284_v38, %v4616_v43  ;;  %v2171_v43 = vpack.c.bf16 %v3314_v4, %v3313_v49  ;;  %v4710_v4 = vrot.slane %v2176_v8, %v3975_v19 }
 0x3fc   : > { %2082 = vmatmul.mubr.bf16.gmra.mrb[36].mxu0 %v1853_v31  ;;  %v1795_v33 = vmul.f32 %v3286_v14, %v4609_v60  ;;  %v3315_v60 = vld [vmem:[%s3513_s19 + $0x40] sm:$0xff]  ;;  %s3388_s19 = smov [#allocation2]  }
 0x3fd   : > { %2091 = vmatprep.mubr.bf16.mxu0 %v1856_v61  ;;  %2311 = vmatmul.mubr.bf16.gmra.mrb[20].mxu1 %v2169_v20  ;;  %v2172_v7 = vpack.c.bf16 %v3316_v2, %v3315_v60  ;;  %s3327_s27 = sshll.u32 %s3388_s19, 4  ;;  %s3328_s27 = int_to_ptr.vmem [resolvable:$false] %s3327_s27 }
 0x3fe   : > { %2320 = vmatprep.mubr.bf16.mxu1 %v3387_v27  ;;  %v1855_v5 = vpack.c.bf16 %v1797_v17, %v1795_v33  ;;  %v1867_v33 = vld [vmem:[%s4857_s9] sm:$0x3]  ;;  %s3329_s15 = scalar_lea.vmem %s3328_s27, 8192  ;;  %p3330_p0 = scmp.lt.s32.totalorder %s4799_s29, %s3328_s27 }
 0x3ff   : > { %v4700_v26 = vrot.slane %v1867_v33, %v3968_v6  ;;  %p3331_p1 = scmp.lt.s32.totalorder %s3329_s15, %s3323_s30 }
 0x401   : > { %p3332_p2 = por %p3331_p1, %p3330_p0 }
 0x403   : > { %p3333_p3 = pnand %p3332_p2, %p3326_p13 }
 0x404   : > { %2092 = vmatmul.mubr.bf16.gmra.mrb[40].mxu0 %v1855_v5  ;;  %v4707_v5 = vrot.slane %v2176_v8, %v3968_v6 }
 0x405   : > { %2321 = vmatmul.mubr.bf16.gmra.mrb[24].mxu1 %v2170_v15  ;;  %v4703_v15 = vrot.slane %v1867_v33, %v3975_v19 }
 0x406   : > { %2330 = vmatprep.mubr.bf16.mxu1 %v3387_v27 }
 0x40d   : > { %2331 = vmatmul.mubr.bf16.gmra.mrb[28].mxu1 %v2171_v43 }
 0x40e   : > { %2340 = vmatprep.mubr.bf16.mxu1 %v3387_v27 }
 0x415   : > { %2341 = vmatmul.mubr.bf16.gmra.mrb[0].mxu1 %v2172_v7 }
 0x416   : > { %2350 = vmatprep.mubr.bf16.mxu1 %v3387_v27 }
 0x41d   : > { %2351 = vmatmul.mubr.bf16.gmra.mrb[4].mxu1 %v2173_v36 }
 0x41e   : > { %2360 = vmatprep.mubr.bf16.mxu1 %v3387_v27 }
 0x425   : > { %2361 = vmatmul.mubr.bf16.gmra.mrb[8].mxu1 %v2174_v51 }
 0x426   : > { %2370 = vmatprep.mubr.bf16.mxu1 %v3387_v27 }
 0x42d   : > { %2371 = vmatmul.mubr.bf16.gmra.mrb[12].mxu1 %v2175_v56  ;;  %v1401_v24 = vpop.xlane.xlu0 %1400 }
 0x42e   : > { %v1435_v32 = vmul.f32 0.00390625, %v1401_v24  ;;  %v1404_v41 = vpop.xlane.xlu1 %1403 }
 0x42f   : > { %v1436_v18 = vmul.f32 0.00390625, %v1404_v41 }
 0x430   : > { %v1451_v45 = vadd.f32 1e-05, %v1435_v32 }
 0x431   : > { %v1452_v53 = vadd.f32 1e-05, %v1436_v18 }
 0x432   : > { %3287 = vrsqrt.f32 %v1451_v45 }
 0x433   : > { %3289 = vrsqrt.f32 %v1452_v53 }
 0x43c   : > { %v3288_v48 = vpop.eup %3287 }
 0x43d   : > { %v3290_v10 = vpop.eup %3289  ;;  %v1489_v13 = vmul.f32 %v3288_v48, %v4363_v50  ;;  %v1490_v9 = vmul.f32 %v3288_v48, %v4366_v63 }
 0x43e   : > { %v1491_v27 = vmul.f32 %v3290_v10, %v4369_v37  ;;  %v1492_v29 = vmul.f32 %v3290_v10, %v4372_v22 }
 0x43f   : > { %v1533_v54 = vmul.f32 %v4392_v46, %v1490_v9  ;;  %v1532_v42 = vmul.f32 %v4389_v59, %v1489_v13 }
 0x440   : > { %v1535_v44 = vmul.f32 %v4392_v46, %v1492_v29  ;;  %v1534_v47 = vmul.f32 %v4389_v59, %v1491_v27 }
 0x441   : > { %v1576_v12 = vadd.f32 %v4399_v34, %v1533_v54  ;;  %v1575_v23 = vadd.f32 %v4396_v58, %v1532_v42 }
 0x442   : > { %v1578_v50 = vadd.f32 %v4399_v34, %v1535_v44  ;;  %v1577_v63 = vadd.f32 %v4396_v58, %v1534_v47 }
 0x443   : > { %v2622_v21 = vmul.f32 -1.442695, %v1576_v12  ;;  %v2621_v37 = vmul.f32 -1.442695, %v1575_v23 }
 0x444   : > { %v2624_v39 = vmul.f32 -1.442695, %v1578_v50  ;;  %v2623_v22 = vmul.f32 -1.442695, %v1577_v63 }
 0x445   : > { %3291 = vpow2.f32 %v2622_v21 }
 0x446   : > { %3293 = vpow2.f32 %v2624_v39 }
 0x447   : > { %3295 = vpow2.f32 %v2621_v37 }
 0x448   : > { %3297 = vpow2.f32 %v2623_v22 }
 0x44f   : > { %v3292_v55 = vpop.eup %3291 }
 0x450   : > { %v3294_v46 = vpop.eup %3293  ;;  %v1704_v62 = vadd.f32 1.0, %v3292_v55 }
 0x451   : > { %v3296_v59 = vpop.eup %3295  ;;  %v1706_v16 = vadd.f32 1.0, %v3294_v46 }
 0x452   : > { %v3298_v40 = vpop.eup %3297  ;;  %3299 = vrcp.f32 %v1704_v62  ;;  %v1703_v30 = vadd.f32 1.0, %v3296_v59 }
 0x453   : > { %3301 = vrcp.f32 %v1706_v16  ;;  %v1705_v34 = vadd.f32 1.0, %v3298_v40 }
 0x454   : > { %3303 = vrcp.f32 %v1703_v30 }
 0x455   : > { %3305 = vrcp.f32 %v1705_v34 }
 0x45c   : > { %v3300_v58 = vpop.eup %3299 }
 0x45d   : > { %v3302_v25 = vpop.eup %3301  ;;  %v1800_v52 = vmul.f32 %v3300_v58, %v1576_v12 }
 0x45e   : > { %v3304_v35 = vpop.eup %3303  ;;  %v1802_v20 = vmul.f32 %v3302_v25, %v1578_v50 }
 0x45f   : > { %v3306_v31 = vpop.eup %3305  ;;  %v1799_v61 = vmul.f32 %v3304_v35, %v1575_v23 }
 0x460   : > { %v1858_v38 = vpack.c.bf16 %v1802_v20, %v1800_v52  ;;  %v1801_v14 = vmul.f32 %v3306_v31, %v1577_v63 }
 0x462   : > { %2101 = vmatprep.mubr.bf16.mxu0 %v1858_v38  ;;  %v1857_v17 = vpack.c.bf16 %v1801_v14, %v1799_v61 }
 0x464   : > { %2102 = vmatmul.mubr.bf16.gmra.mrb[44].mxu0 %v1857_v17 }
 0x4c7   : > { %v2073_v49 = vpop.f32.mrb[32].mxu0 }
 0x4c8   : > { %v2074_v43 = vadd.f32 %v2073_v49, %v4700_v26  ;;  %v2075_v60 = vpop.f32.mrb[33].mxu0  ;;  %v2302_v2 = vpop.f32.mrb[16].mxu1 }
 0x4c9   : > { %v2076_v7 = vadd.f32 %v2075_v60, %v4703_v15  ;;  %v2077_v1 = vpop.f32.mrb[34].mxu0  ;;  %v2304_v3 = vpop.f32.mrb[17].mxu1 }
 0x4ca   : > { %v2078_v36 = vadd.f32 %v2077_v1, %v4700_v26  ;;  %v2079_v28 = vpop.f32.mrb[35].mxu0  ;;  %v2730_v6 = vadd.f32 %v4707_v5, %v2074_v43  ;;  %v2306_v57 = vpop.f32.mrb[18].mxu1  ;;  %v2779_v1 = vadd.f32 %v4710_v4, %v4703_v15 }
 0x4cb   : > { %v2080_v51 = vadd.f32 %v2079_v28, %v4703_v15  ;;  %v2733_v19 = vadd.f32 %v4710_v4, %v2076_v7  ;;  %v2308_v0 = vpop.f32.mrb[19].mxu1  ;;  %v2777_v7 = vadd.f32 %v4707_v5, %v4700_v26 }
 0x4cc   : > { %v2731_v11 = vadd.f32 %v2730_v6, %v2302_v2  ;;  %v2736_v56 = vadd.f32 %v4707_v5, %v2078_v36 }
 0x4cd   : > { %v2734_v24 = vadd.f32 %v2733_v19, %v2304_v3  ;;  %v2739_v32 = vadd.f32 %v4710_v4, %v2080_v51 }
 0x4ce   : > { %2413 = vst [vmem:[%s4722_s28] sm:$0xff] %v2731_v11  ;;  %v2737_v41 = vadd.f32 %v2736_v56, %v2306_v57 }
 0x4cf   : > { %2414 = vst [vmem:[%s4722_s28 + $0x8] sm:$0xff] %v2734_v24  ;;  %v2740_v18 = vadd.f32 %v2739_v32, %v2308_v0  ;;  %v2083_v45 = vpop.f32.mrb[36].mxu0 }
 0x4d0   : > { %2415 = vst [vmem:[%s4722_s28 + $0x10] sm:$0xff] %v2737_v41  ;;  %v2084_v53 = vadd.f32 %v2083_v45, %v4700_v26  ;;  %v2085_v48 = vpop.f32.mrb[37].mxu0  ;;  %v2312_v10 = vpop.f32.mrb[20].mxu1 }
 0x4d1   : > { %2416 = vst [vmem:[%s4722_s28 + $0x18] sm:$0xff] %v2740_v18  ;;  %v2086_v13 = vadd.f32 %v2085_v48, %v4703_v15  ;;  %v2087_v9 = vpop.f32.mrb[38].mxu0  ;;  %v2314_v27 = vpop.f32.mrb[21].mxu1 }
 0x4d2   : > { %v2088_v29 = vadd.f32 %v2087_v9, %v4700_v26  ;;  %v2089_v54 = vpop.f32.mrb[39].mxu0  ;;  %v2742_v42 = vadd.f32 %v4707_v5, %v2084_v53  ;;  %v2316_v44 = vpop.f32.mrb[22].mxu1 }
 0x4d3   : > { %v2090_v47 = vadd.f32 %v2089_v54, %v4703_v15  ;;  %v2745_v12 = vadd.f32 %v4710_v4, %v2086_v13  ;;  %v2318_v23 = vpop.f32.mrb[23].mxu1 }
 0x4d4   : > { %v2743_v50 = vadd.f32 %v2742_v42, %v2312_v10  ;;  %v2748_v63 = vadd.f32 %v4707_v5, %v2088_v29 }
 0x4d5   : > { %v2746_v21 = vadd.f32 %v2745_v12, %v2314_v27  ;;  %v2751_v37 = vadd.f32 %v4710_v4, %v2090_v47 }
 0x4d6   : > { %2417 = vst [vmem:[%s4722_s28 + $0x20] sm:$0xff] %v2743_v50  ;;  %v2749_v39 = vadd.f32 %v2748_v63, %v2316_v44 }
 0x4d7   : > { %2418 = vst [vmem:[%s4722_s28 + $0x28] sm:$0xff] %v2746_v21  ;;  %v2752_v22 = vadd.f32 %v2751_v37, %v2318_v23  ;;  %v2093_v55 = vpop.f32.mrb[40].mxu0 }
 0x4d8   : > { %2419 = vst [vmem:[%s4722_s28 + $0x30] sm:$0xff] %v2749_v39  ;;  %v2094_v46 = vadd.f32 %v2093_v55, %v4700_v26  ;;  %v2095_v62 = vpop.f32.mrb[41].mxu0  ;;  %v2322_v59 = vpop.f32.mrb[24].mxu1 }
 0x4d9   : > { %2420 = vst [vmem:[%s4722_s28 + $0x38] sm:$0xff] %v2752_v22  ;;  %v2096_v16 = vadd.f32 %v2095_v62, %v4703_v15  ;;  %v2097_v40 = vpop.f32.mrb[42].mxu0  ;;  %v2324_v30 = vpop.f32.mrb[25].mxu1 }
 0x4da   : > { %v2098_v34 = vadd.f32 %v2097_v40, %v4700_v26  ;;  %v2099_v58 = vpop.f32.mrb[43].mxu0  ;;  %v2754_v25 = vadd.f32 %v4707_v5, %v2094_v46  ;;  %v2326_v35 = vpop.f32.mrb[26].mxu1 }
 0x4db   : > { %v2100_v52 = vadd.f32 %v2099_v58, %v4703_v15  ;;  %v2757_v20 = vadd.f32 %v4710_v4, %v2096_v16  ;;  %v2328_v31 = vpop.f32.mrb[27].mxu1 }
 0x4dc   : > { %v2755_v38 = vadd.f32 %v2754_v25, %v2322_v59  ;;  %v2760_v61 = vadd.f32 %v4707_v5, %v2098_v34 }
 0x4dd   : > { %v2758_v14 = vadd.f32 %v2757_v20, %v2324_v30  ;;  %v2763_v17 = vadd.f32 %v4710_v4, %v2100_v52 }
 0x4de   : > { %2421 = vst [vmem:[%s4722_s28 + $0x40] sm:$0xff] %v2755_v38  ;;  %v2761_v33 = vadd.f32 %v2760_v61, %v2326_v35 }
 0x4df   : > { %2422 = vst [vmem:[%s4722_s28 + $0x48] sm:$0xff] %v2758_v14  ;;  %v2764_v8 = vadd.f32 %v2763_v17, %v2328_v31 }
 0x4e0   : > { %2423 = vst [vmem:[%s4722_s28 + $0x50] sm:$0xff] %v2761_v33  ;;  %v4751_v49 = vpop.f32.mrb[28].mxu1 }
 0x4e1   : > { %2424 = vst [vmem:[%s4722_s28 + $0x58] sm:$0xff] %v2764_v8  ;;  %v4754_v43 = vpop.f32.mrb[29].mxu1 }
 0x4e2   : > { %v4756_v60 = vpop.f32.mrb[30].mxu1 }
 0x4e3   : > { %v4758_v2 = vpop.f32.mrb[31].mxu1 }
 0x4e8   : > { %v2342_v3 = vpop.f32.mrb[0].mxu1 }
 0x4e9   : > { %v2778_v36 = vadd.f32 %v2777_v7, %v2342_v3  ;;  %v2344_v28 = vpop.f32.mrb[1].mxu1 }
 0x4ea   : > { %v2780_v6 = vadd.f32 %v2779_v1, %v2344_v28  ;;  %v2346_v57 = vpop.f32.mrb[2].mxu1 }
 0x4eb   : > { %2429 = vst [vmem:[%s4722_s28 + $0x80] sm:$0xff] %v2778_v36  ;;  %v2782_v51 = vadd.f32 %v2777_v7, %v2346_v57  ;;  %v2348_v19 = vpop.f32.mrb[3].mxu1 }
 0x4ec   : > { %2430 = vst [vmem:[%s4722_s28 + $0x88] sm:$0xff] %v2780_v6  ;;  %v2784_v0 = vadd.f32 %v2779_v1, %v2348_v19 }
 0x4ed   : > { %2431 = vst [vmem:[%s4722_s28 + $0x90] sm:$0xff] %v2782_v51 }
 0x4ee   : > { %2432 = vst [vmem:[%s4722_s28 + $0x98] sm:$0xff] %v2784_v0 }
 0x4f0   : > { %v2352_v11 = vpop.f32.mrb[4].mxu1 }
 0x4f1   : > { %v2786_v56 = vadd.f32 %v2777_v7, %v2352_v11  ;;  %v2354_v24 = vpop.f32.mrb[5].mxu1 }
 0x4f2   : > { %v2788_v32 = vadd.f32 %v2779_v1, %v2354_v24  ;;  %v2356_v41 = vpop.f32.mrb[6].mxu1 }
 0x4f3   : > { %2433 = vst [vmem:[%s4722_s28 + $0xa0] sm:$0xff] %v2786_v56  ;;  %v2790_v18 = vadd.f32 %v2777_v7, %v2356_v41  ;;  %v2358_v45 = vpop.f32.mrb[7].mxu1 }
 0x4f4   : > { %2434 = vst [vmem:[%s4722_s28 + $0xa8] sm:$0xff] %v2788_v32  ;;  %v2792_v53 = vadd.f32 %v2779_v1, %v2358_v45 }
 0x4f5   : > { %2435 = vst [vmem:[%s4722_s28 + $0xb0] sm:$0xff] %v2790_v18 }
 0x4f6   : > { %2436 = vst [vmem:[%s4722_s28 + $0xb8] sm:$0xff] %v2792_v53 }
 0x4f8   : > { %v2362_v48 = vpop.f32.mrb[8].mxu1 }
 0x4f9   : > { %v2794_v10 = vadd.f32 %v2777_v7, %v2362_v48  ;;  %v2364_v13 = vpop.f32.mrb[9].mxu1 }
 0x4fa   : > { %v2796_v9 = vadd.f32 %v2779_v1, %v2364_v13  ;;  %v2366_v27 = vpop.f32.mrb[10].mxu1 }
 0x4fb   : > { %2437 = vst [vmem:[%s4722_s28 + $0xc0] sm:$0xff] %v2794_v10  ;;  %v2798_v29 = vadd.f32 %v2777_v7, %v2366_v27  ;;  %v2368_v54 = vpop.f32.mrb[11].mxu1 }
 0x4fc   : > { %2438 = vst [vmem:[%s4722_s28 + $0xc8] sm:$0xff] %v2796_v9  ;;  %v2800_v42 = vadd.f32 %v2779_v1, %v2368_v54 }
 0x4fd   : > { %2439 = vst [vmem:[%s4722_s28 + $0xd0] sm:$0xff] %v2798_v29 }
 0x4fe   : > { %2440 = vst [vmem:[%s4722_s28 + $0xd8] sm:$0xff] %v2800_v42 }
 0x500   : > { %v2372_v44 = vpop.f32.mrb[12].mxu1 }
 0x501   : > { %v2802_v47 = vadd.f32 %v2777_v7, %v2372_v44  ;;  %v2374_v12 = vpop.f32.mrb[13].mxu1 }
 0x502   : > { %v2804_v23 = vadd.f32 %v2779_v1, %v2374_v12  ;;  %v2376_v50 = vpop.f32.mrb[14].mxu1 }
 0x503   : > { %2441 = vst [vmem:[%s4722_s28 + $0xe0] sm:$0xff] %v2802_v47  ;;  %v2806_v63 = vadd.f32 %v2777_v7, %v2376_v50  ;;  %v2378_v21 = vpop.f32.mrb[15].mxu1 }
 0x504   : > { %2442 = vst [vmem:[%s4722_s28 + $0xe8] sm:$0xff] %v2804_v23  ;;  %v2808_v37 = vadd.f32 %v2779_v1, %v2378_v21 }
 0x505   : > { %2443 = vst [vmem:[%s4722_s28 + $0xf0] sm:$0xff] %v2806_v63 }
 0x506   : > { %2444 = vst [vmem:[%s4722_s28 + $0xf8] sm:$0xff] %v2808_v37 }
 0x537   : > { %v2103_v39 = vpop.f32.mrb[44].mxu0 }
 0x538   : > { %v2104_v22 = vadd.f32 %v2103_v39, %v4700_v26  ;;  %v2105_v55 = vpop.f32.mrb[45].mxu0 }
 0x539   : > { %v2106_v46 = vadd.f32 %v2105_v55, %v4703_v15  ;;  %v2107_v62 = vpop.f32.mrb[46].mxu0 }
 0x53a   : > { %v2766_v59 = vadd.f32 %v4707_v5, %v2104_v22  ;;  %v2108_v16 = vadd.f32 %v2107_v62, %v4700_v26  ;;  %v2109_v40 = vpop.f32.mrb[47].mxu0 }
 0x53b   : > { %v2769_v30 = vadd.f32 %v4710_v4, %v2106_v46  ;;  %v2110_v34 = vadd.f32 %v2109_v40, %v4703_v15 }
 0x53c   : > { %v2767_v58 = vadd.f32 %v2766_v59, %v4751_v49  ;;  %v2772_v25 = vadd.f32 %v4707_v5, %v2108_v16 }
 0x53d   : > { %v2770_v35 = vadd.f32 %v2769_v30, %v4754_v43  ;;  %v2775_v52 = vadd.f32 %v4710_v4, %v2110_v34 }
 0x53e   : > { %2425 = vst [vmem:[%s4722_s28 + $0x60] sm:$0xff] %v2767_v58  ;;  %v2773_v26 = vadd.f32 %v2772_v25, %v4756_v60 }
 0x53f   : > { %2426 = vst [vmem:[%s4722_s28 + $0x68] sm:$0xff] %v2770_v35  ;;  %v2776_v15 = vadd.f32 %v2775_v52, %v4758_v2 }
 0x540   : > { %2427 = vst [vmem:[%s4722_s28 + $0x70] sm:$0xff] %v2773_v26 }
 0x541   : > { %2428 = vst [vmem:[%s4722_s28 + $0x78] sm:$0xff] %v2776_v15 }
 0x542   : > { %3336 = shalt.err (!%p3333_p3)
}
 0x543   : > { %s3337_s16 = scalar_lea.hbm %s4797_s23, 4096  ;;  %s3341_s28 = scalar_lea.hbm %s4860_s12, 8192 }
 0x544   : > { %p3338_p4 = scmp.ne.s32.totalorder %s4797_s23, %s3337_s16  ;;  %p3342_p9 = scmp.lt.u32.totalorder %s4797_s23, %s4860_s12 }
 0x545   : > { %p3343_p10 = scmp.lt.u32.totalorder %s3341_s28, %s3337_s16  ;;  %p3345_p12 = scmp.lt.u32.totalorder %s3337_s16, %s4797_s23 }
 0x546   : > { %p3339_p7 = pnand %p3338_p4, %p3494_p5 }
 0x547   : > { %p3344_p11 = por %p3343_p10, %p3342_p9 }
 0x548   : > { %p3340_p8 = pneg %p3339_p7 }
 0x549   : > { %p3346_p13 = por %p3345_p12, %p3344_p11 }
 0x54b   : > { %p3347_p0 = pnand %p3346_p13, %p3340_p8 }
 0x54d   : > { %3350 = shalt.err (!%p3347_p0)
}
 0x54e   : > { %s3389_s0 = smov 256   ;;  %s3390_s30 = smov 16  }
 0x54f   : > { %2825 = dma.vmem_to_hbm [thread:$0]  (%p3494_p5), %s4799_s29, 4096, %s4797_s23, %s4807_s25, %s3389_s0, %s3389_s0, %s3390_s30  }
 0x550 PF: > { %p2831_p1 = scmp.ge.s32.totalorder %s3385_s24, 2  ;;  %s2475_s19 = sand.u32 1, %s3373_s21  }
 0x551   : > { %s2476_s27 = scalar_lea.sflag [#allocation3], %s2475_s19 }
 0x552   : > { %p2828_p2 = pnand %p2831_p1, %p3498_p6 }
 0x554   : > { %3368 = dma.done.wait (!%p2828_p2), %s2476_s27, 4096  }
 0x555   : > { %3370 = vsyncadd (!%p2828_p2), %s2476_s27, 4294963200  ;;  %s4873_s24 = sld [smem:[#allocation6_spill]]  ;;  %s4874_s15 = sld [smem:[#allocation5_spill]] }
 0x556   : > { %s4875_s23 = sld [smem:[#allocation7_spill]]  ;;  %s4876_s21 = smov %s3377_s22 }
 0x55b   : > { %p22_p3 = scmp.ge.s32.totalorder %s4873_s24, 4   ;;  %s4877_s22 = smov %s4874_s15 }
 0x55d   :  { %24 = sbr.rel (!%p22_p3) target bundleno = 5 (0x5), region = 106 }
 0x564   :  { %2481 = vsyncpa [#allocation3], 1 }
 0x565   :  { %2483 = vsyncpa [#allocation3 + $0x1], 1 }

</bundles_post_ra>
